<compile_context>
chip_gen: v5e
topology: v5e:2x2
jax: 0.10.0
libtpu: 0.0.40
codegen_flags: <defaults>
</compile_context>

<pallas_src>
import functools

import jax
import jax.numpy as jnp
from jax.experimental import pallas as pl
from jax.experimental.pallas import tpu as pltpu


def _residual_conv3x3_kernel(x_ref, halo_ref, w_ref, b_ref, o_ref,
                             slab_ref, acc_ref):
    # x_ref    : (1, TH, W, C)      input strip (conv input AND residual)
    # halo_ref : (1, 2, W, C)       row above / row below this strip
    #                               (already zero at the image borders)
    # w_ref    : (3, C, 3*C)        weights: w_ref[dy][ci, dx*C + co]
    # b_ref    : (1, C)             bias
    # o_ref    : (1, TH, W, C)      output strip
    # slab_ref : (TH+2, Wp, C) f32  zero-padded input slab, Wp = rnd8(W+2)
    # acc_ref  : (TH, W, C)  f32    accumulator
    _, TH, W, C = x_ref.shape
    Wp = slab_ref.shape[1]
    cdt = w_ref.dtype                       # MXU operand dtype (bf16)

    # ---- build the zero-padded slab in VMEM (no HBM pad round trip) ---------
    slab_ref[:, 0:1, :] = jnp.zeros((TH + 2, 1, C), jnp.float32)           # left
    slab_ref[:, W + 1:Wp, :] = jnp.zeros((TH + 2, Wp - W - 1, C),
                                         jnp.float32)                     # right
    hal = halo_ref[...]                                                    # (1,2,W,C)
    slab_ref[0:1, 1:W + 1, :] = hal[0, 0:1, :, :]                          # top halo
    slab_ref[TH + 1:TH + 2, 1:W + 1, :] = hal[0, 1:2, :, :]                # bottom halo
    slab_ref[1:TH + 1, 1:W + 1, :] = x_ref[0]                              # interior

    # ---- epilogue terms first: residual + bias (exact, f32) -----------------
    acc_ref[...] = (x_ref[0].astype(jnp.float32)
                    + b_ref[...].astype(jnp.float32).reshape(1, 1, C))

    # ---- 3x3 conv: 3 fat matmuls, dx folded into the output dim -------------
    for dy in range(3):                                   # unrolled, static
        a = slab_ref[dy:dy + TH, :, :].reshape(TH * Wp, C).astype(cdt)
        y = jnp.dot(a, w_ref[dy],
                    preferred_element_type=jnp.float32)   # (TH*Wp, 3C)
        y = y.reshape(TH, Wp, 3 * C)
        acc_ref[...] += (y[:, 0:W,               0:C]
                         + y[:, 1:W + 1,     C:2 * C]
                         + y[:, 2:W + 2, 2 * C:3 * C])

    o_ref[0] = acc_ref[...].astype(o_ref.dtype)


def residual_conv3x3(x_nchw, weight, bias, *, tile_h=8,
                     compute_dtype=jnp.bfloat16):
    """out = Conv2d(C, C, 3, padding=1)(x) + x  (PyTorch NCHW semantics)."""
    N, C, H, W = x_nchw.shape
    tile_h = min(tile_h, H)
    assert H % tile_h == 0, "tile_h must divide H"
    n_strips = H // tile_h
    w_pad = ((W + 2 + 7) // 8) * 8          # slab width, multiple of 8 sublanes

    # NCHW -> NHWC: lane-dense channels for the matmul formulation.
    x = jnp.transpose(x_nchw, (0, 2, 3, 1))               # (N, H, W, C)

    # Per-strip one-row halos (zero rows at the image borders).  This is a tiny
    # side input (2 rows per strip) instead of re-padding / re-shipping the
    # whole image through HBM.
    zrow = jnp.zeros((N, 1, W, C), dtype=x.dtype)
    top = jnp.concatenate([zrow, x[:, tile_h - 1:H - 1:tile_h]], axis=1)
    bot = jnp.concatenate([x[:, tile_h:H:tile_h], zrow], axis=1)
    halo = jnp.stack([top, bot], axis=2)                  # (N, n_strips, 2, W, C)
    halo = halo.reshape(N * n_strips, 2, W, C)

    # PyTorch weight (Cout, Cin, kh, kw) -> (kh, Cin, kw*Cout):
    #   w3[dy][ci, dx*C + co] = weight[co, ci, dy, dx]
    w3 = jnp.transpose(weight, (2, 1, 3, 0)).reshape(3, C, 3 * C)
    w3 = w3.astype(compute_dtype)                         # bf16 MXU operands
    b = bias.reshape(1, C)

    out_nhwc = pl.pallas_call(
        _residual_conv3x3_kernel,
        out_shape=jax.ShapeDtypeStruct((N, H, W, C), x.dtype),
        grid_spec=pltpu.PrefetchScalarGridSpec(
            num_scalar_prefetch=0,
            grid=(N, n_strips),
            in_specs=[
                pl.BlockSpec((1, tile_h, W, C), lambda n, h: (n, h, 0, 0)),
                pl.BlockSpec((1, 2, W, C),
                             lambda n, h: (n * n_strips + h, 0, 0, 0)),
                pl.BlockSpec((3, C, 3 * C), lambda n, h: (0, 0, 0)),
                pl.BlockSpec((1, C), lambda n, h: (0, 0)),
            ],
            out_specs=pl.BlockSpec((1, tile_h, W, C),
                                   lambda n, h: (n, h, 0, 0)),
            scratch_shapes=[
                pltpu.VMEM((tile_h + 2, w_pad, C), jnp.float32),  # padded slab
                pltpu.VMEM((tile_h, W, C), jnp.float32),          # accumulator
            ],
        ),
        compiler_params=pltpu.CompilerParams(
            dimension_semantics=("parallel", "parallel")),
    )(x, halo, w3, b)

    return jnp.transpose(out_nhwc, (0, 3, 1, 2))          # NHWC -> NCHW


def _reference(x_nchw, weight, bias):
    # Pure-JAX reference: conv3x3 same padding + bias + residual (NCHW, f32).
    y = jax.lax.conv_general_dilated(
        x_nchw, weight, window_strides=(1, 1), padding="SAME",
        dimension_numbers=("NCHW", "OIHW", "NCHW"))
    return y + bias[None, :, None, None] + x_nchw


if __name__ == "__main__":
    key = jax.random.PRNGKey(0)
    kx, kw, kb = jax.random.split(key, 3)

    N, C, H, W = 2, 8, 16, 16
    x = jax.random.normal(kx, (N, C, H, W), dtype=jnp.float32)
    weight = jax.random.normal(kw, (C, C, 3, 3), dtype=jnp.float32) * 0.1
    bias = jax.random.normal(kb, (C,), dtype=jnp.float32) * 0.1

    run = jax.jit(functools.partial(residual_conv3x3, tile_h=8))
    out = jax.block_until_ready(run(x, weight, bias))

    ref = _reference(x, weight, bias)
    assert out.shape == ref.shape and out.dtype == ref.dtype
    # bf16 MXU operands (f32 accumulate + exact f32 bias/residual epilogue)
    # -> relaxed-but-safe tolerance.
    assert jnp.allclose(out, ref, atol=2e-2, rtol=2e-2), "mismatch vs reference"

    print("KERNEL_OK")
</pallas_src>

<mosaic_0001>
module attributes {stable_mosaic.version = 11 : i64} {
  func.func @_residual_conv3x3_kernel(%arg0: i32, %arg1: i32, %arg2: memref<1x8x16x8xf32, #tpu.memory_space<vmem>>, %arg3: memref<1x2x16x8xf32, #tpu.memory_space<vmem>>, %arg4: memref<3x8x24xbf16, #tpu.memory_space<vmem>>, %arg5: memref<1x8xf32, #tpu.memory_space<vmem>>, %arg6: memref<1x8x16x8xf32, #tpu.memory_space<vmem>>, %arg7: memref<10x24x8xf32, #tpu.memory_space<vmem>>, %arg8: memref<8x16x8xf32, #tpu.memory_space<vmem>>) attributes {dimension_semantics = [#tpu.dimension_semantics<parallel>, #tpu.dimension_semantics<parallel>], iteration_bounds = array<i64: 2, 2>, scalar_prefetch = 0 : i64, scratch_operands = 2 : i64, tpu.core_type = #tpu.core_type<tc>, window_params = [{transform_indices = @transform_0, window_bounds = array<i64: 1, 8, 16, 8>}, {transform_indices = @transform_1, window_bounds = array<i64: 1, 2, 16, 8>}, {pipeline_mode = #tpu.pipeline_mode<synchronous>, transform_indices = @transform_2, window_bounds = array<i64: 3, 8, 24>}, {pipeline_mode = #tpu.pipeline_mode<synchronous>, transform_indices = @transform_3, window_bounds = array<i64: 1, 8>}, {transform_indices = @transform_4, window_bounds = array<i64: 1, 8, 16, 8>}]} {
    %cst = arith.constant 0.000000e+00 : f32
    %0 = vector.broadcast %cst : f32 to vector<10x1x8xf32>
    %c0 = arith.constant 0 : index
    %c0_0 = arith.constant 0 : index
    %c0_1 = arith.constant 0 : index
    %1 = vector.load %arg7[%c0, %c0_0, %c0_1] : memref<10x24x8xf32, #tpu.memory_space<vmem>>, vector<10x1x8xf32>
    tpu.vector_store %arg7[%c0, %c0_0, %c0_1], %0 {strides = array<i32>} : memref<10x24x8xf32, #tpu.memory_space<vmem>>, vector<10x1x8xf32>,
    %cst_2 = arith.constant 0.000000e+00 : f32
    %2 = vector.broadcast %cst_2 : f32 to vector<10x7x8xf32>
    %c0_3 = arith.constant 0 : index
    %c17 = arith.constant 17 : index
    %c0_4 = arith.constant 0 : index
    %3 = vector.load %arg7[%c0_3, %c17, %c0_4] : memref<10x24x8xf32, #tpu.memory_space<vmem>>, vector<10x7x8xf32>
    tpu.vector_store %arg7[%c0_3, %c17, %c0_4], %2 {strides = array<i32>} : memref<10x24x8xf32, #tpu.memory_space<vmem>>, vector<10x7x8xf32>,
    %c0_5 = arith.constant 0 : index
    %c0_6 = arith.constant 0 : index
    %c0_7 = arith.constant 0 : index
    %c0_8 = arith.constant 0 : index
    %4 = vector.load %arg3[%c0_5, %c0_6, %c0_7, %c0_8] : memref<1x2x16x8xf32, #tpu.memory_space<vmem>>, vector<1x2x16x8xf32>
    %5 = vector.extract_strided_slice %4 {offsets = [0, 0, 0, 0], sizes = [1, 1, 16, 8], strides = [1, 1, 1, 1]} : vector<1x2x16x8xf32> to vector<1x1x16x8xf32>
    %6 = vector.shape_cast %5 : vector<1x1x16x8xf32> to vector<1x16x8xf32>
    %c0_9 = arith.constant 0 : index
    %c1 = arith.constant 1 : index
    %c0_10 = arith.constant 0 : index
    %7 = vector.load %arg7[%c0_9, %c1, %c0_10] : memref<10x24x8xf32, #tpu.memory_space<vmem>>, vector<1x16x8xf32>
    tpu.vector_store %arg7[%c0_9, %c1, %c0_10], %6 {strides = array<i32>} : memref<10x24x8xf32, #tpu.memory_space<vmem>>, vector<1x16x8xf32>,
    %8 = vector.extract_strided_slice %4 {offsets = [0, 1, 0, 0], sizes = [1, 1, 16, 8], strides = [1, 1, 1, 1]} : vector<1x2x16x8xf32> to vector<1x1x16x8xf32>
    %9 = vector.shape_cast %8 : vector<1x1x16x8xf32> to vector<1x16x8xf32>
    %c9 = arith.constant 9 : index
    %c1_11 = arith.constant 1 : index
    %c0_12 = arith.constant 0 : index
    %10 = vector.load %arg7[%c9, %c1_11, %c0_12] : memref<10x24x8xf32, #tpu.memory_space<vmem>>, vector<1x16x8xf32>
    tpu.vector_store %arg7[%c9, %c1_11, %c0_12], %9 {strides = array<i32>} : memref<10x24x8xf32, #tpu.memory_space<vmem>>, vector<1x16x8xf32>,
    %c0_13 = arith.constant 0 : index
    %c0_14 = arith.constant 0 : index
    %c0_15 = arith.constant 0 : index
    %c0_16 = arith.constant 0 : index
    %11 = vector.load %arg2[%c0_13, %c0_14, %c0_15, %c0_16] : memref<1x8x16x8xf32, #tpu.memory_space<vmem>>, vector<1x8x16x8xf32>
    %12 = vector.shape_cast %11 : vector<1x8x16x8xf32> to vector<8x16x8xf32>
    %c1_17 = arith.constant 1 : index
    %c1_18 = arith.constant 1 : index
    %c0_19 = arith.constant 0 : index
    %13 = vector.load %arg7[%c1_17, %c1_18, %c0_19] : memref<10x24x8xf32, #tpu.memory_space<vmem>>, vector<8x16x8xf32>
    tpu.vector_store %arg7[%c1_17, %c1_18, %c0_19], %12 {strides = array<i32>} : memref<10x24x8xf32, #tpu.memory_space<vmem>>, vector<8x16x8xf32>,
    %c0_20 = arith.constant 0 : index
    %c0_21 = arith.constant 0 : index
    %c0_22 = arith.constant 0 : index
    %c0_23 = arith.constant 0 : index
    %14 = vector.load %arg2[%c0_20, %c0_21, %c0_22, %c0_23] : memref<1x8x16x8xf32, #tpu.memory_space<vmem>>, vector<1x8x16x8xf32>
    %15 = vector.shape_cast %14 : vector<1x8x16x8xf32> to vector<8x16x8xf32>
    %c0_24 = arith.constant 0 : index
    %c0_25 = arith.constant 0 : index
    %16 = vector.load %arg5[%c0_24, %c0_25] : memref<1x8xf32, #tpu.memory_space<vmem>>, vector<1x8xf32>
    %17 = vector.shape_cast %16 : vector<1x8xf32> to vector<1x1x8xf32>
    %18 = vector.broadcast %17 : vector<1x1x8xf32> to vector<8x16x8xf32>
    %19 = arith.addf %15, %18 : vector<8x16x8xf32>
    %c0_26 = arith.constant 0 : index
    %c0_27 = arith.constant 0 : index
    %c0_28 = arith.constant 0 : index
    %20 = vector.load %arg8[%c0_26, %c0_27, %c0_28] : memref<8x16x8xf32, #tpu.memory_space<vmem>>, vector<8x16x8xf32>
    tpu.vector_store %arg8[%c0_26, %c0_27, %c0_28], %19 {strides = array<i32>} : memref<8x16x8xf32, #tpu.memory_space<vmem>>, vector<8x16x8xf32>,
    %c0_29 = arith.constant 0 : index
    %c0_30 = arith.constant 0 : index
    %c0_31 = arith.constant 0 : index
    %21 = vector.load %arg7[%c0_29, %c0_30, %c0_31] : memref<10x24x8xf32, #tpu.memory_space<vmem>>, vector<8x24x8xf32>
    %22 = vector.shape_cast %21 : vector<8x24x8xf32> to vector<192x8xf32>
    %23 = arith.truncf %22 : vector<192x8xf32> to vector<192x8xbf16>
    %c0_32 = arith.constant 0 : index
    %c0_33 = arith.constant 0 : index
    %c0_34 = arith.constant 0 : index
    %24 = vector.load %arg4[%c0_32, %c0_33, %c0_34] : memref<3x8x24xbf16, #tpu.memory_space<vmem>>, vector<1x8x24xbf16>
    %25 = vector.shape_cast %24 : vector<1x8x24xbf16> to vector<8x24xbf16>
    %cst_35 = arith.constant dense<0.000000e+00> : vector<192x24xf32>
    %26 = tpu.matmul %23, %25, %cst_35 {dimension_numbers = #tpu.dot_dimension_numbers<[1], [0], [0], [1], [0, 0, 1, 1], [], []>} : vector<192x8xbf16>, vector<8x24xbf16>, vector<192x24xf32> -> vector<192x24xf32>
    %27 = vector.shape_cast %26 : vector<192x24xf32> to vector<8x24x24xf32>
    %c0_36 = arith.constant 0 : index
    %c0_37 = arith.constant 0 : index
    %c0_38 = arith.constant 0 : index
    %28 = vector.load %arg8[%c0_36, %c0_37, %c0_38] : memref<8x16x8xf32, #tpu.memory_space<vmem>>, vector<8x16x8xf32>
    %29 = vector.extract_strided_slice %27 {offsets = [0, 0, 0], sizes = [8, 16, 8], strides = [1, 1, 1]} : vector<8x24x24xf32> to vector<8x16x8xf32>
    %30 = vector.extract_strided_slice %27 {offsets = [0, 1, 8], sizes = [8, 16, 8], strides = [1, 1, 1]} : vector<8x24x24xf32> to vector<8x16x8xf32>
    %31 = arith.addf %29, %30 : vector<8x16x8xf32>
    %32 = vector.extract_strided_slice %27 {offsets = [0, 2, 16], sizes = [8, 16, 8], strides = [1, 1, 1]} : vector<8x24x24xf32> to vector<8x16x8xf32>
    %33 = arith.addf %31, %32 : vector<8x16x8xf32>
    %34 = arith.addf %28, %33 : vector<8x16x8xf32>
    %c0_39 = arith.constant 0 : index
    %c0_40 = arith.constant 0 : index
    %c0_41 = arith.constant 0 : index
    %35 = vector.load %arg8[%c0_39, %c0_40, %c0_41] : memref<8x16x8xf32, #tpu.memory_space<vmem>>, vector<8x16x8xf32>
    tpu.vector_store %arg8[%c0_39, %c0_40, %c0_41], %34 {strides = array<i32>} : memref<8x16x8xf32, #tpu.memory_space<vmem>>, vector<8x16x8xf32>,
    %c1_42 = arith.constant 1 : index
    %c0_43 = arith.constant 0 : index
    %c0_44 = arith.constant 0 : index
    %36 = vector.load %arg7[%c1_42, %c0_43, %c0_44] : memref<10x24x8xf32, #tpu.memory_space<vmem>>, vector<8x24x8xf32>
    %37 = vector.shape_cast %36 : vector<8x24x8xf32> to vector<192x8xf32>
    %38 = arith.truncf %37 : vector<192x8xf32> to vector<192x8xbf16>
    %c1_45 = arith.constant 1 : index
    %c0_46 = arith.constant 0 : index
    %c0_47 = arith.constant 0 : index
    %39 = vector.load %arg4[%c1_45, %c0_46, %c0_47] : memref<3x8x24xbf16, #tpu.memory_space<vmem>>, vector<1x8x24xbf16>
    %40 = vector.shape_cast %39 : vector<1x8x24xbf16> to vector<8x24xbf16>
    %cst_48 = arith.constant dense<0.000000e+00> : vector<192x24xf32>
    %41 = tpu.matmul %38, %40, %cst_48 {dimension_numbers = #tpu.dot_dimension_numbers<[1], [0], [0], [1], [0, 0, 1, 1], [], []>} : vector<192x8xbf16>, vector<8x24xbf16>, vector<192x24xf32> -> vector<192x24xf32>
    %42 = vector.shape_cast %41 : vector<192x24xf32> to vector<8x24x24xf32>
    %c0_49 = arith.constant 0 : index
    %c0_50 = arith.constant 0 : index
    %c0_51 = arith.constant 0 : index
    %43 = vector.load %arg8[%c0_49, %c0_50, %c0_51] : memref<8x16x8xf32, #tpu.memory_space<vmem>>, vector<8x16x8xf32>
    %44 = vector.extract_strided_slice %42 {offsets = [0, 0, 0], sizes = [8, 16, 8], strides = [1, 1, 1]} : vector<8x24x24xf32> to vector<8x16x8xf32>
    %45 = vector.extract_strided_slice %42 {offsets = [0, 1, 8], sizes = [8, 16, 8], strides = [1, 1, 1]} : vector<8x24x24xf32> to vector<8x16x8xf32>
    %46 = arith.addf %44, %45 : vector<8x16x8xf32>
    %47 = vector.extract_strided_slice %42 {offsets = [0, 2, 16], sizes = [8, 16, 8], strides = [1, 1, 1]} : vector<8x24x24xf32> to vector<8x16x8xf32>
    %48 = arith.addf %46, %47 : vector<8x16x8xf32>
    %49 = arith.addf %43, %48 : vector<8x16x8xf32>
    %c0_52 = arith.constant 0 : index
    %c0_53 = arith.constant 0 : index
    %c0_54 = arith.constant 0 : index
    %50 = vector.load %arg8[%c0_52, %c0_53, %c0_54] : memref<8x16x8xf32, #tpu.memory_space<vmem>>, vector<8x16x8xf32>
    tpu.vector_store %arg8[%c0_52, %c0_53, %c0_54], %49 {strides = array<i32>} : memref<8x16x8xf32, #tpu.memory_space<vmem>>, vector<8x16x8xf32>,
    %c2 = arith.constant 2 : index
    %c0_55 = arith.constant 0 : index
    %c0_56 = arith.constant 0 : index
    %51 = vector.load %arg7[%c2, %c0_55, %c0_56] : memref<10x24x8xf32, #tpu.memory_space<vmem>>, vector<8x24x8xf32>
    %52 = vector.shape_cast %51 : vector<8x24x8xf32> to vector<192x8xf32>
    %53 = arith.truncf %52 : vector<192x8xf32> to vector<192x8xbf16>
    %c2_57 = arith.constant 2 : index
    %c0_58 = arith.constant 0 : index
    %c0_59 = arith.constant 0 : index
    %54 = vector.load %arg4[%c2_57, %c0_58, %c0_59] : memref<3x8x24xbf16, #tpu.memory_space<vmem>>, vector<1x8x24xbf16>
    %55 = vector.shape_cast %54 : vector<1x8x24xbf16> to vector<8x24xbf16>
    %cst_60 = arith.constant dense<0.000000e+00> : vector<192x24xf32>
    %56 = tpu.matmul %53, %55, %cst_60 {dimension_numbers = #tpu.dot_dimension_numbers<[1], [0], [0], [1], [0, 0, 1, 1], [], []>} : vector<192x8xbf16>, vector<8x24xbf16>, vector<192x24xf32> -> vector<192x24xf32>
    %57 = vector.shape_cast %56 : vector<192x24xf32> to vector<8x24x24xf32>
    %c0_61 = arith.constant 0 : index
    %c0_62 = arith.constant 0 : index
    %c0_63 = arith.constant 0 : index
    %58 = vector.load %arg8[%c0_61, %c0_62, %c0_63] : memref<8x16x8xf32, #tpu.memory_space<vmem>>, vector<8x16x8xf32>
    %59 = vector.extract_strided_slice %57 {offsets = [0, 0, 0], sizes = [8, 16, 8], strides = [1, 1, 1]} : vector<8x24x24xf32> to vector<8x16x8xf32>
    %60 = vector.extract_strided_slice %57 {offsets = [0, 1, 8], sizes = [8, 16, 8], strides = [1, 1, 1]} : vector<8x24x24xf32> to vector<8x16x8xf32>
    %61 = arith.addf %59, %60 : vector<8x16x8xf32>
    %62 = vector.extract_strided_slice %57 {offsets = [0, 2, 16], sizes = [8, 16, 8], strides = [1, 1, 1]} : vector<8x24x24xf32> to vector<8x16x8xf32>
    %63 = arith.addf %61, %62 : vector<8x16x8xf32>
    %64 = arith.addf %58, %63 : vector<8x16x8xf32>
    %c0_64 = arith.constant 0 : index
    %c0_65 = arith.constant 0 : index
    %c0_66 = arith.constant 0 : index
    %65 = vector.load %arg8[%c0_64, %c0_65, %c0_66] : memref<8x16x8xf32, #tpu.memory_space<vmem>>, vector<8x16x8xf32>
    tpu.vector_store %arg8[%c0_64, %c0_65, %c0_66], %64 {strides = array<i32>} : memref<8x16x8xf32, #tpu.memory_space<vmem>>, vector<8x16x8xf32>,
    %c0_67 = arith.constant 0 : index
    %c0_68 = arith.constant 0 : index
    %c0_69 = arith.constant 0 : index
    %66 = vector.load %arg8[%c0_67, %c0_68, %c0_69] : memref<8x16x8xf32, #tpu.memory_space<vmem>>, vector<8x16x8xf32>
    %c0_70 = arith.constant 0 : index
    %c0_71 = arith.constant 0 : index
    %c0_72 = arith.constant 0 : index
    %c0_73 = arith.constant 0 : index
    %67 = vector.load %arg6[%c0_70, %c0_71, %c0_72, %c0_73] : memref<1x8x16x8xf32, #tpu.memory_space<vmem>>, vector<1x8x16x8xf32>
    %68 = vector.shape_cast %67 : vector<1x8x16x8xf32> to vector<8x16x8xf32>
    %69 = vector.shape_cast %66 : vector<8x16x8xf32> to vector<1x8x16x8xf32>
    tpu.vector_store %arg6[%c0_70, %c0_71, %c0_72, %c0_73], %69 {strides = array<i32>} : memref<1x8x16x8xf32, #tpu.memory_space<vmem>>, vector<1x8x16x8xf32>,
    return
  }
  func.func @transform_0(%arg0: i32, %arg1: i32) -> (i32, i32, i32, i32) {
    %c0_i32 = arith.constant 0 : i32
    %c0_i32_0 = arith.constant 0 : i32
    %c0_i32_1 = arith.constant 0 : i32
    return %arg0, %arg1, %c0_i32, %c0_i32_0 : i32, i32, i32, i32
  }
  func.func @transform_1(%arg0: i32, %arg1: i32) -> (i32, i32, i32, i32) {
    %c2_i32 = arith.constant 2 : i32
    %0 = arith.muli %arg0, %c2_i32 : i32
    %1 = arith.addi %0, %arg1 : i32
    %c0_i32 = arith.constant 0 : i32
    %c0_i32_0 = arith.constant 0 : i32
    %c0_i32_1 = arith.constant 0 : i32
    %c0_i32_2 = arith.constant 0 : i32
    return %1, %c0_i32, %c0_i32_0, %c0_i32_1 : i32, i32, i32, i32
  }
  func.func @transform_2(%arg0: i32, %arg1: i32) -> (i32, i32, i32) {
    %c0_i32 = arith.constant 0 : i32
    %c0_i32_0 = arith.constant 0 : i32
    %c0_i32_1 = arith.constant 0 : i32
    %c0_i32_2 = arith.constant 0 : i32
    return %c0_i32, %c0_i32_0, %c0_i32_1 : i32, i32, i32
  }
  func.func @transform_3(%arg0: i32, %arg1: i32) -> (i32, i32) {
    %c0_i32 = arith.constant 0 : i32
    %c0_i32_0 = arith.constant 0 : i32
    %c0_i32_1 = arith.constant 0 : i32
    return %c0_i32, %c0_i32_0 : i32, i32
  }
  func.func @transform_4(%arg0: i32, %arg1: i32) -> (i32, i32, i32, i32) {
    %c0_i32 = arith.constant 0 : i32
    %c0_i32_0 = arith.constant 0 : i32
    %c0_i32_1 = arith.constant 0 : i32
    return %arg0, %arg1, %c0_i32, %c0_i32_0 : i32, i32, i32, i32
  }
}

</mosaic_0001>

<bundles_post_ra>
// kernel: residual_conv3x3.1
= control target key start
LH: loop header
LB: loop body
LE: loop exit
PB: predicated region body
PF: predicated region fallthrough
CT: control target
= control target key end

     0   :  { %s1993_s15 = smov 0   ;;  %s1995_s16 = smov 0   ;;  %s2952_s0 = inlined_call_operand.vmem [shape: f32[2,16,16,8], index: 0, kind: input, shape index: {}]   ;;  %s2953_s1 = inlined_call_operand.vmem [shape: f32[4,2,16,8], index: 1, kind: input, shape index: {}]   ;;  %s2954_s2 = inlined_call_operand.vmem [shape: bf16[3,8,24], index: 2, kind: input, shape index: {}]   ;;  %s2955_s3 = inlined_call_operand.vmem [shape: f32[1,8], index: 3, kind: input, shape index: {}]   ;;  %s2956_s4 = inlined_call_operand.vmem [shape: f32[2,16,16,8], index: 4, kind: output, shape index: {}]  }
   0x1   :  { %s1997_s17 = smov 0   ;;  %s1999_s18 = smov 0  }
   0x2   :  { %s2001_s19 = smov 0  }
   0x3 LB: > { %s23_s20 = sadd.s32 1, %s1955_s17  ;;  %s26_s21 = sadd.s32 1, %s1959_s18  ;;  %s1963_s19 = sphi %s2001_s19, %s14_s19   ;;  %s1959_s18 = sphi %s1999_s18, %s2961_s18   ;;  %s1955_s17 = sphi %s1997_s17, %s2960_s17   ;;  %s1951_s16 = sphi %s1995_s16, %s2959_s16   ;;  %s1947_s15 = sphi %s1993_s15, %s2958_s15  }
   0x4   : > { %p24_p0 = scmp.ge.s32.totalorder %s23_s20, 2  ;;  %p1824_p1 = scmp.ge.s32.totalorder %s1963_s19, 1 }
   0x5   : > { %p202_p2 = scmp.lt.s32.totalorder %s1963_s19, 5 }
   0x6   : > { %s2963_s20 = smov (%p24_p0, %s23_s20), 0  ;;  %s2965_s21 = smov (!%p24_p0, %s26_s21), %s1959_s18 }
   0x7   : > { %p203_p3 = pnand %p1824_p1, %p202_p2  ;;  %p28_p4 = scmp.ge.s32.totalorder %s2965_s21, 2 }
   0x8   : > { %s1829_s26 = sshll.u32 (!%p203_p3), %s1951_s16, 1  ;;  %s1825_s30 = sshll.u32 (!%p203_p3), %s1947_s15, 3 }
   0x9   : > { %s2967_s21 = smov (%p28_p4, %s2965_s21), 0  ;;  %206 = sbr.rel (%p203_p3) target bundleno = 551 (0x227), region = 36 }
   0xa   : > { %s257_s29 = sadd.s32 (!%p203_p3), %s1947_s15, %s1829_s26  ;;  %p246_p6 = scmp.lt.s32.totalorder (!%p203_p3), %s1951_s16, 1 }
   0xb   : > { %p258_p5 = scmp.lt.s32.totalorder (!%p203_p3), %s257_s29, 3  ;;  %p2047_p7 = scmp.lt.s32.totalorder (!%p203_p3), %s1825_s30, 15 }
   0xc   : > { %s1966_s22 = smov (!%p203_p3), 112   ;;  %s1967_s23 = smov (!%p203_p3), 120  }
   0xe   : > { %v430_v0 = vld [vmem:[%s2954_s2] sm:$0xf]  ;;  %vm467_vm0 = vcmask 1043456   ;;  %v1848_v1 = vld [vmem:[%s2954_s2 + $0x4] sm:$0xf]  ;;  %vm277_vm1 = vcmask 57344  }
   0xf   : > { %v469_v2 = vsel %vm467_vm0, %v430_v0, 0  ;;  %v897_v3 = vsel %vm467_vm0, %v1848_v1, 0  ;;  %v1861_v4 = vld [vmem:[%s2954_s2 + $0x8] sm:$0xf]  ;;  %v1965_v6 = vmov 0.0   ;;  %s2969_s29 = smov (!%p258_p5, %s257_s29), 3 }
  0x10   : > { %478 = vmatpush.bf16.msra.mxu0 %v469_v2  ;;  %1877 = vmatpush.bf16.msra.mxu3 %v469_v2  ;;  %v2038_v5 = vsel %vm467_vm0, %v1861_v4, 0  ;;  %278 = vst.msk [vmem:[#allocation2] sm:$0x1] %vm277_vm1, %v1965_v6  ;;  %s2971_s16 = smov (!%p246_p6, %s1951_s16), 1  ;;  %s1876_s6 = sshll.u32 %s2969_s29, 5  ;;  %vm303_vm2 = vcmask 64512  }
  0x11   : > { %906 = vmatpush.bf16.msra.mxu1 %v897_v3  ;;  %1333 = vmatpush.bf16.msra.mxu2 %v2038_v5  ;;  %279 = vst.msk [vmem:[#allocation2 + $0x18] sm:$0x1] %vm277_vm1, %v1965_v6  ;;  %s2061_s9 = scalar_lea.vmem %s2953_s1, %s1876_s6  ;;  %s1827_s10 = sshll.u32 %s2971_s16, 5  ;;  %vm288_vm3 = vcmask 63488   ;;  %vm685_vm4 = vcmask 1045504   ;;  %vm580_vm5 = vcmask 1046528  }
  0x12   : > { %280 = vst.msk [vmem:[#allocation2 + $0x30] sm:$0x1] %vm277_vm1, %v1965_v6  ;;  %v299_v7 = vld [vmem:[%s2061_s9] sm:$0xff]  ;;  %v300_v8 = vld [vmem:[%s2061_s9 + $0x8] sm:$0xff]  ;;  %s2973_s30 = smov (!%p2047_p7, %s1825_s30), 15 }
  0x13   : > { %281 = vst.msk [vmem:[#allocation2 + $0x48] sm:$0x1] %vm277_vm1, %v1965_v6  ;;  %s1826_s11 = sshll.u32 %s2973_s30, 1 }
  0x14   : > { %1878 = vmatpush.bf16.msrb.mxu3 %v897_v3  ;;  %282 = vst.msk [vmem:[#allocation2 + $0x60] sm:$0x1] %vm277_vm1, %v1965_v6  ;;  %s2075_s12 = sadd.s32 %s1827_s10, %s1826_s11 }
  0x15   : > { %283 = vst.msk [vmem:[#allocation2 + $0x78] sm:$0x1] %vm277_vm1, %v1965_v6  ;;  %s1828_s13 = sshll.u32 %s2075_s12, 3 }
  0x16   : > { %284 = vst.msk [vmem:[#allocation2 + $0x90] sm:$0x1] %vm277_vm1, %v1965_v6  ;;  %s2087_s16 = scalar_lea.vmem %s2952_s0, %s1828_s13  ;;  %s2536_s28 = scalar_lea.vmem %s2956_s4, %s1828_s13 }
  0x17   : > { %304 = vst.msk [vmem:[#allocation2 + $0x1] sm:$0xff] %vm303_vm2, %v299_v7  ;;  %v319_v9 = vld [vmem:[%s2087_s16 + $0x50] sm:$0xff]  ;;  %v320_v10 = vld [vmem:[%s2087_s16 + $0x58] sm:$0xff]  ;;  %v2092_v11 = vld [vmem:[%s2087_s16] sm:$0xff] }
  0x18   : > { %305 = vst.msk [vmem:[#allocation2 + $0x9] sm:$0xff] %vm303_vm2, %v300_v8  ;;  %v2098_v12 = vld [vmem:[%s2087_s16 + $0x8] sm:$0xff]  ;;  %v311_v14 = vld [vmem:[%s2087_s16 + $0x10] sm:$0xff]  ;;  %v312_v16 = vld [vmem:[%s2087_s16 + $0x18] sm:$0xff] }
  0x19   : > { %285 = vst.msk [vmem:[#allocation2 + $0xa8] sm:$0x1] %vm277_vm1, %v1965_v6  ;;  %v2135_v26 = vld [vmem:[%s2087_s16 + $0x60] sm:$0xff]  ;;  %v2145_v30 = vld [vmem:[%s2087_s16 + $0x68] sm:$0xff]  ;;  %v315_v41 = vld [vmem:[%s2087_s16 + $0x30] sm:$0xff] }
  0x1a   : > { %286 = vst.msk [vmem:[#allocation2 + $0xc0] sm:$0x1] %vm277_vm1, %v1965_v6  ;;  %v313_v28 = vld [vmem:[%s2087_s16 + $0x20] sm:$0xff]  ;;  %v314_v31 = vld [vmem:[%s2087_s16 + $0x28] sm:$0xff]  ;;  %v316_v42 = vld [vmem:[%s2087_s16 + $0x38] sm:$0xff] }
  0x1b   : > { %287 = vst.msk [vmem:[#allocation2 + $0xd8] sm:$0x1] %vm277_vm1, %v1965_v6  ;;  %v2176_v51 = vld [vmem:[%s2087_s16 + $0x70] sm:$0xff]  ;;  %v317_v52 = vld [vmem:[%s2087_s16 + $0x40] sm:$0xff]  ;;  %v324_v58 = vld [vmem:[%s2087_s16 + $0x78] sm:$0xff] }
  0x1c   : > { %289 = vst.msk [vmem:[#allocation2 + $0x11] sm:$0x7f] %vm288_vm3, %v1965_v6  ;;  %v318_v59 = vld [vmem:[%s2087_s16 + $0x48] sm:$0xff] }
  0x1d   : > { %336 = vst.msk [vmem:[#allocation2 + $0x91] sm:$0xff] %vm303_vm2, %v319_v9 }
  0x1e   : > { %v394_v13 = vld [vmem:[#allocation2] sm:$0xff]  ;;  %337 = vst.msk [vmem:[#allocation2 + $0x99] sm:$0xff] %vm303_vm2, %v320_v10 }
  0x1f   : > { %v395_v15 = vld [vmem:[#allocation2 + $0x8] sm:$0xff]  ;;  %326 = vst.msk [vmem:[#allocation2 + $0x19] sm:$0xff] %vm303_vm2, %v2092_v11 }
  0x20   : > { %v418_v17 = vpack.c.bf16 %v395_v15, %v394_v13  ;;  %327 = vst.msk [vmem:[#allocation2 + $0x21] sm:$0xff] %vm303_vm2, %v2098_v12 }
  0x21   : > { %328 = vst.msk [vmem:[#allocation2 + $0x31] sm:$0xff] %vm303_vm2, %v311_v14 }
  0x22   : > { %1836 = vmatmul.msk.bf16.vlgmr.msra.gmra.mxu0 %vm303_vm2, %v418_v17  ;;  %329 = vst.msk [vmem:[#allocation2 + $0x39] sm:$0xff] %vm303_vm2, %v312_v16 }
  0x23   : > { %290 = vst.msk [vmem:[#allocation2 + $0x29] sm:$0x7f] %vm288_vm3, %v1965_v6  ;;  %v396_v29 = vld [vmem:[#allocation2 + $0x10] sm:$0xff] }
  0x24   : > { %v2112_v18 = vld [vmem:[#allocation2 + $0x90] sm:$0xff]  ;;  %291 = vst.msk [vmem:[#allocation2 + $0x41] sm:$0x7f] %vm288_vm3, %v1965_v6 }
  0x25   : > { %v2116_v19 = vld [vmem:[#allocation2 + $0x98] sm:$0xff]  ;;  %292 = vst.msk [vmem:[#allocation2 + $0x59] sm:$0x7f] %vm288_vm3, %v1965_v6 }
  0x26   : > { %v2122_v20 = vpack.c.bf16 %v2116_v19, %v2112_v18  ;;  %v822_v21 = vld [vmem:[#allocation2 + $0x18] sm:$0xff]  ;;  %293 = vst.msk [vmem:[#allocation2 + $0x71] sm:$0x7f] %vm288_vm3, %v1965_v6 }
  0x27   : > { %v823_v22 = vld [vmem:[#allocation2 + $0x20] sm:$0xff]  ;;  %294 = vst.msk [vmem:[#allocation2 + $0x89] sm:$0x7f] %vm288_vm3, %v1965_v6  ;;  %v419_v32 = vpack.c.bf16 %v822_v21, %v396_v29 }
  0x28   : > { %1845 = vmatmul.msk.bf16.vlgmr.msra.gmra.mxu3 %vm303_vm2, %v2122_v20  ;;  %v846_v23 = vpack.c.bf16 %v823_v22, %v822_v21  ;;  %v1249_v24 = vld [vmem:[#allocation2 + $0x30] sm:$0xff]  ;;  %295 = vst.msk [vmem:[#allocation2 + $0xa1] sm:$0x7f] %vm288_vm3, %v1965_v6 }
  0x29   : > { %v1250_v25 = vld [vmem:[#allocation2 + $0x38] sm:$0xff]  ;;  %296 = vst.msk [vmem:[#allocation2 + $0xb9] sm:$0x7f] %vm288_vm3, %v1965_v6  ;;  %1879 = vmatpush.bf16.msra.mxu3 %v2038_v5 }
  0x2a   : > { %1849 = vmatmul.msk.bf16.vlgmr.msra.gmra.mxu1 %vm303_vm2, %v846_v23  ;;  %v1273_v27 = vpack.c.bf16 %v1250_v25, %v1249_v24  ;;  %297 = vst.msk [vmem:[#allocation2 + $0xd1] sm:$0x7f] %vm288_vm3, %v1965_v6  ;;  %v824_v35 = vld [vmem:[#allocation2 + $0x28] sm:$0xff] }
  0x2b   : > { %298 = vst.msk [vmem:[#allocation2 + $0xe9] sm:$0x7f] %vm288_vm3, %v1965_v6  ;;  %v1251_v37 = vld [vmem:[#allocation2 + $0x40] sm:$0xff]  ;;  %v847_v39 = vpack.c.bf16 %v1249_v24, %v824_v35  ;;  %v420_v43 = vpack.c.bf16 %v824_v35, %v823_v22  ;;  %v301_v24 = vld [vmem:[%s2061_s9 + $0x10] sm:$0xff] }
  0x2c   : > { %1862 = vmatmul.msk.bf16.vlgmr.msra.gmra.mxu2 %vm303_vm2, %v1273_v27  ;;  %338 = vst.msk [vmem:[#allocation2 + $0xa9] sm:$0xff] %vm303_vm2, %v2135_v26  ;;  %v848_v49 = vpack.c.bf16 %v1251_v37, %v1250_v25 }
  0x2d   : > { %330 = vst.msk [vmem:[#allocation2 + $0x49] sm:$0xff] %vm303_vm2, %v313_v28 }
  0x2e   : > { %339 = vst.msk [vmem:[#allocation2 + $0xb1] sm:$0xff] %vm303_vm2, %v2145_v30 }
  0x2f   : > { %331 = vst.msk [vmem:[#allocation2 + $0x51] sm:$0xff] %vm303_vm2, %v314_v31  ;;  %v2155_v33 = vld [vmem:[#allocation2 + $0xa0] sm:$0xff] }
  0x30   : > { %332 = vst.msk [vmem:[#allocation2 + $0x61] sm:$0xff] %vm303_vm2, %v315_v41 }
  0x31   : > { %333 = vst.msk [vmem:[#allocation2 + $0x69] sm:$0xff] %vm303_vm2, %v316_v42 }
  0x32   : > { %1837 = vmatmul.msk.bf16.gmra.mxu0 %vm303_vm2, %v419_v32  ;;  %340 = vst.msk [vmem:[#allocation2 + $0xc1] sm:$0xff] %vm303_vm2, %v2176_v51 }
  0x33   : > { %v415_v34 = vld [vmem:[#allocation2 + $0xa8] sm:$0xff]  ;;  %334 = vst.msk [vmem:[#allocation2 + $0x79] sm:$0xff] %vm303_vm2, %v317_v52 }
  0x34   : > { %v2159_v36 = vpack.c.bf16 %v415_v34, %v2155_v33  ;;  %v1252_v38 = vld [vmem:[#allocation2 + $0x48] sm:$0xff]  ;;  %341 = vst.msk [vmem:[#allocation2 + $0xc9] sm:$0xff] %vm303_vm2, %v324_v58 }
  0x35   : > { %v1274_v40 = vpack.c.bf16 %v1252_v38, %v1251_v37  ;;  %v416_v44 = vld [vmem:[#allocation2 + $0xb0] sm:$0xff]  ;;  %v417_v45 = vld [vmem:[#allocation2 + $0xb8] sm:$0xff]  ;;  %335 = vst.msk [vmem:[#allocation2 + $0x81] sm:$0xff] %vm303_vm2, %v318_v59 }
  0x36   : > { %v2170_v46 = vpack.c.bf16 %v417_v45, %v416_v44  ;;  %v1253_v47 = vld [vmem:[#allocation2 + $0x50] sm:$0xff]  ;;  %v1254_v48 = vld [vmem:[#allocation2 + $0x58] sm:$0xff]  ;;  %v855_v53 = vpack.c.bf16 %v416_v44, %v415_v34  ;;  %307 = vst.msk [vmem:[#allocation2 + $0xd9] sm:$0xff] %vm303_vm2, %v301_v24 }
  0x37   : > { %v1275_v50 = vpack.c.bf16 %v1254_v48, %v1253_v47  ;;  %v1255_v54 = vld [vmem:[#allocation2 + $0x60] sm:$0xff]  ;;  %v849_v56 = vpack.c.bf16 %v1253_v47, %v1252_v38 }
  0x38   : > { %1846 = vmatmul.msk.bf16.gmra.mxu3 %vm303_vm2, %v2159_v36  ;;  %v1256_v55 = vld [vmem:[#allocation2 + $0x68] sm:$0xff]  ;;  %v1257_v62 = vld [vmem:[#allocation2 + $0x70] sm:$0xff]  ;;  %v850_v0 = vpack.c.bf16 %v1255_v54, %v1254_v48 }
  0x39   : > { %v1276_v57 = vpack.c.bf16 %v1256_v55, %v1255_v54  ;;  %v843_v60 = vld [vmem:[#allocation2 + $0xc0] sm:$0xff]  ;;  %v851_v7 = vpack.c.bf16 %v1257_v62, %v1256_v55 }
  0x3a   : > { %1850 = vmatmul.msk.bf16.gmra.mxu1 %vm303_vm2, %v847_v39  ;;  %v856_v61 = vpack.c.bf16 %v843_v60, %v417_v45  ;;  %v1258_v63 = vld [vmem:[#allocation2 + $0x78] sm:$0xff] }
  0x3b   : > { %v1277_v1 = vpack.c.bf16 %v1258_v63, %v1257_v62  ;;  %v844_v2 = vld [vmem:[#allocation2 + $0xc8] sm:$0xff]  ;;  %v845_v3 = vld [vmem:[#allocation2 + $0xd0] sm:$0xff] }
  0x3c   : > { %1863 = vmatmul.msk.bf16.gmra.mxu2 %vm303_vm2, %v1274_v40  ;;  %v857_v4 = vpack.c.bf16 %v845_v3, %v844_v2  ;;  %v1259_v5 = vld [vmem:[#allocation2 + $0x80] sm:$0xff]  ;;  %v1260_v6 = vld [vmem:[#allocation2 + $0x88] sm:$0xff]  ;;  %v1282_v13 = vpack.c.bf16 %v844_v2, %v843_v60 }
  0x3d   : > { %v1278_v8 = vpack.c.bf16 %v1260_v6, %v1259_v5  ;;  %v852_v10 = vpack.c.bf16 %v1259_v5, %v1258_v63  ;;  %v853_v29 = vpack.c.bf16 %v2112_v18, %v1260_v6  ;;  %v1270_v38 = vld [vmem:[#allocation2 + $0xd8] sm:$0xff] }
  0x3e   : > { %v1283_v18 = vpack.c.bf16 %v1270_v38, %v845_v3  ;;  %v302_v6 = vld [vmem:[%s2061_s9 + $0x18] sm:$0xff] }
  0x3f   : > { %308 = vst.msk [vmem:[#allocation2 + $0xe1] sm:$0xff] %vm303_vm2, %v302_v6 }
  0x42   : > { %1838 = vmatmul.msk.bf16.gmra.mxu0 %vm303_vm2, %v420_v43 }
  0x46   : > { %v1272_v24 = vld [vmem:[#allocation2 + $0xe8] sm:$0xff] }
  0x48   : > { %1847 = vmatmul.msk.bf16.gmra.mxu3 %vm303_vm2, %v2170_v46 }
  0x4a   : > { %1851 = vmatmul.msk.bf16.gmra.mxu1 %vm303_vm2, %v848_v49 }
  0x4c   : > { %1864 = vmatmul.msk.bf16.gmra.mxu2 %vm303_vm2, %v1275_v50 }
  0x52   : > { %1839 = vmatmul.msk.bf16.gmra.mxu0 %vm303_vm2, %v1273_v27 }
  0x58   : > { %1858 = vmatmul.msk.bf16.vlgmr.msrb.gmra.mxu3 %vm303_vm2, %v855_v53 }
  0x5a   : > { %1852 = vmatmul.msk.bf16.gmra.mxu1 %vm303_vm2, %v849_v56 }
  0x5c   : > { %1865 = vmatmul.msk.bf16.gmra.mxu2 %vm303_vm2, %v1276_v57 }
  0x62   : > { %1840 = vmatmul.msk.bf16.gmra.mxu0 %vm303_vm2, %v1274_v40 }
  0x68   : > { %1859 = vmatmul.msk.bf16.gmra.mxu3 %vm303_vm2, %v856_v61 }
  0x6a   : > { %1853 = vmatmul.msk.bf16.gmra.mxu1 %vm303_vm2, %v850_v0 }
  0x6c   : > { %1866 = vmatmul.msk.bf16.gmra.mxu2 %vm303_vm2, %v1277_v1 }
  0x72   : > { %1841 = vmatmul.msk.bf16.gmra.mxu0 %vm303_vm2, %v1275_v50 }
  0x78   : > { %1860 = vmatmul.msk.bf16.gmra.mxu3 %vm303_vm2, %v857_v4 }
  0x7a   : > { %1854 = vmatmul.msk.bf16.gmra.mxu1 %vm303_vm2, %v851_v7 }
  0x7c   : > { %1867 = vmatmul.msk.bf16.gmra.mxu2 %vm303_vm2, %v1278_v8 }
  0x82   : > { %1842 = vmatmul.msk.bf16.gmra.mxu0 %vm303_vm2, %v1276_v57 }
  0x88   : > { %1871 = vmatmul.msk.bf16.vlgmr.msra.gmra.mxu3 %vm303_vm2, %v1282_v13 }
  0x8a   : > { %1855 = vmatmul.msk.bf16.gmra.mxu1 %vm303_vm2, %v852_v10 }
  0x8c   : > { %1868 = vmatmul.msk.bf16.gmra.mxu2 %vm303_vm2, %v2122_v20 }
  0x92   : > { %1843 = vmatmul.msk.bf16.gmra.mxu0 %vm303_vm2, %v1277_v1 }
  0x98   : > { %1872 = vmatmul.msk.bf16.gmra.mxu3 %vm303_vm2, %v1283_v18 }
  0x9a   : > { %1856 = vmatmul.msk.bf16.gmra.mxu1 %vm303_vm2, %v853_v29 }
  0x9c   : > { %1869 = vmatmul.msk.bf16.gmra.mxu2 %vm303_vm2, %v2159_v36 }
  0x9f   : > { %v2205_v9 = vpop.f32.mrf.mxu0 }
  0xa0   : > { %v581_v16 = vrot.slane %v2205_v9, 1  ;;  %v686_v17 = vrot.slane %v2205_v9, 2 }
  0xa2   : > { %1844 = vmatmul.msk.bf16.gmra.mxu0 %vm303_vm2, %v1278_v8  ;;  %v854_v8 = vpack.c.bf16 %v2155_v33, %v2116_v19 }
  0xa7   : > { %v2210_v14 = vpop.f32.mrf.mxu1  ;;  %v2212_v15 = vpop.f32.mrf.mxu0 }
  0xa8   : > { %v582_v20 = vrot.slane %v2212_v15, 1  ;;  %v687_v21 = vrot.slane %v2212_v15, 2  ;;  %v1008_v27 = vrot.slane %v2210_v14, 1  ;;  %v1112_v28 = vrot.slane %v2210_v14, 2 }
  0xaa   : > { %v688_v22 = vsel %vm685_vm4, %v686_v17, %v687_v21  ;;  %v583_v23 = vsel %vm580_vm5, %v581_v16, %v582_v20  ;;  %1857 = vmatmul.msk.bf16.gmra.mxu1 %vm303_vm2, %v854_v8 }
  0xab   : > { %v2221_v25 = vpop.f32.mrf.mxu3  ;;  %726 = vrot.lane.b32.xlu1 %v688_v22, %s1966_s22  ;;  %621 = vrot.lane.b32.xlu0 %v583_v23, %s1967_s23  ;;  %v1271_v23 = vld [vmem:[#allocation2 + $0xe0] sm:$0xff] }
  0xac   : > { %1870 = vmatmul.msk.bf16.gmra.mxu2 %vm303_vm2, %v2170_v46  ;;  %v716_v40 = vrot.slane %v2221_v25, 2  ;;  %v611_v46 = vrot.slane %v2221_v25, 1 }
  0xaf   : > { %v2231_v31 = vpop.f32.mrf.mxu2  ;;  %v2233_v32 = vpop.f32.mrf.mxu1 }
  0xb0   : > { %v1009_v34 = vrot.slane %v2233_v32, 1  ;;  %v1113_v35 = vrot.slane %v2233_v32, 2  ;;  %v1539_v42 = vrot.slane %v2231_v31, 2  ;;  %v1435_v48 = vrot.slane %v2231_v31, 1  ;;  %v485_v53 = vpop.f32.mrf.mxu0 }
  0xb1   : > { %v584_v54 = vrot.slane %v485_v53, 1  ;;  %v689_v55 = vrot.slane %v485_v53, 2 }
  0xb2   : > { %v1010_v36 = vsel %vm580_vm5, %v1008_v27, %v1009_v34  ;;  %v1114_v37 = vsel %vm685_vm4, %v1112_v28, %v1113_v35  ;;  %v1284_v28 = vpack.c.bf16 %v1272_v24, %v1271_v23 }
  0xb3   : > { %1048 = vrot.lane.b32.xlu2 %v1010_v36, %s1967_s23  ;;  %v2241_v39 = vpop.f32.mrf.mxu3  ;;  %1152 = vrot.lane.b32.xlu0 %v1114_v37, %s1966_s22  ;;  %v690_v59 = vsel %vm685_vm4, %v687_v21, %v689_v55  ;;  %v585_v60 = vsel %vm580_vm5, %v582_v20, %v584_v54 }
  0xb4   : > { %v717_v41 = vrot.slane %v2241_v39, 2  ;;  %v612_v43 = vrot.slane %v2241_v39, 1  ;;  %1873 = vmatmul.msk.bf16.gmra.mxu3 %vm303_vm2, %v1284_v28 }
  0xb6   : > { %v718_v44 = vsel %vm685_vm4, %v716_v40, %v717_v41  ;;  %v613_v52 = vsel %vm580_vm5, %v611_v46, %v612_v43 }
  0xb7   : > { %v2250_v45 = vpop.f32.mrf.mxu2  ;;  %750 = vrot.lane.b32.xlu1 %v718_v44, %s1966_s22  ;;  %v913_v57 = vpop.f32.mrf.mxu1 }
  0xb8   : > { %v1540_v47 = vrot.slane %v2250_v45, 2  ;;  %v1436_v49 = vrot.slane %v2250_v45, 1  ;;  %v1115_v58 = vrot.slane %v913_v57, 2  ;;  %v2267_v62 = vpop.f32.mrf.mxu0  ;;  %v1011_v63 = vrot.slane %v913_v57, 1 }
  0xb9   : > { %v586_v21 = vrot.slane %v2267_v62, 1  ;;  %v691_v29 = vrot.slane %v2267_v62, 2 }
  0xba   : > { %v1541_v50 = vsel %vm685_vm4, %v1539_v42, %v1540_v47  ;;  %v1437_v56 = vsel %vm580_vm5, %v1435_v48, %v1436_v49  ;;  %v1116_v1 = vsel %vm685_vm4, %v1113_v35, %v1115_v58  ;;  %v1012_v5 = vsel %vm580_vm5, %v1009_v34, %v1011_v63 }
  0xbb   : > { %1579 = vrot.lane.b32.xlu2 %v1541_v50, %s1966_s22  ;;  %645 = vrot.lane.b32.xlu0 %v613_v52, %s1967_s23  ;;  %v530_v61 = vpop.f32.mrf.mxu3 }
  0xbc   : > { %v719_v0 = vrot.slane %v530_v61, 2  ;;  %v614_v3 = vrot.slane %v530_v61, 1 }
  0xbe   : > { %v720_v4 = vsel %vm685_vm4, %v717_v41, %v719_v0  ;;  %v615_v16 = vsel %vm580_vm5, %v612_v43, %v614_v3 }
  0xbf   : > { %1475 = vrot.lane.b32.xlu1 %v1437_v56, %s1967_s23  ;;  %v2271_v2 = vpop.f32.mrf.mxu1  ;;  %v1340_v7 = vpop.f32.mrf.mxu2 }
  0xc0   : > { %v1438_v10 = vrot.slane %v1340_v7, 1  ;;  %v1542_v13 = vrot.slane %v1340_v7, 2  ;;  %v2283_v17 = vpop.f32.mrf.mxu0  ;;  %v1117_v35 = vrot.slane %v2271_v2, 2  ;;  %v1013_v18 = vrot.slane %v2271_v2, 1 }
  0xc1   : > { %v587_v22 = vrot.slane %v2283_v17, 1  ;;  %v692_v36 = vrot.slane %v2283_v17, 2 }
  0xc2   : > { %v1439_v19 = vsel %vm580_vm5, %v1436_v49, %v1438_v10  ;;  %v1543_v33 = vsel %vm685_vm4, %v1540_v47, %v1542_v13 }
  0xc3   : > { %728 = vrot.lane.b32.xlu2 %v690_v59, %s1966_s22  ;;  %623 = vrot.lane.b32.xlu0 %v585_v60, %s1967_s23  ;;  %v2286_v20 = vpop.f32.mrf.mxu3  ;;  %v588_v38 = vsel %vm580_vm5, %v586_v21, %v587_v22  ;;  %v693_v42 = vsel %vm685_vm4, %v691_v29, %v692_v36 }
  0xc4   : > { %v616_v44 = vrot.slane %v2286_v20, 1  ;;  %v721_v46 = vrot.slane %v2286_v20, 2 }
  0xc7   : > { %1154 = vrot.lane.b32.xlu1 %v1116_v1, %s1966_s22  ;;  %v2292_v27 = vpop.f32.mrf.mxu1  ;;  %v2297_v34 = vpop.f32.mrf.mxu2 }
  0xc8   : > { %v1118_v37 = vrot.slane %v2292_v27, 2  ;;  %v1014_v40 = vrot.slane %v2292_v27, 1  ;;  %v492_v50 = vpop.f32.mrf.mxu0  ;;  %v1544_v53 = vrot.slane %v2297_v34, 2  ;;  %v1440_v58 = vrot.slane %v2297_v34, 1 }
  0xc9   : > { %v589_v0 = vrot.slane %v492_v50, 1  ;;  %v694_v13 = vrot.slane %v492_v50, 2 }
  0xca   : > { %v1119_v41 = vsel %vm685_vm4, %v1117_v35, %v1118_v37  ;;  %v1015_v49 = vsel %vm580_vm5, %v1013_v18, %v1014_v40 }
  0xcb   : > { %752 = vrot.lane.b32.xlu2 %v720_v4, %s1966_s22  ;;  %1050 = vrot.lane.b32.xlu0 %v1012_v5, %s1967_s23  ;;  %v2309_v43 = vpop.f32.mrf.mxu3  ;;  %v590_v7 = vsel %vm580_vm5, %v587_v22, %v589_v0  ;;  %v695_v24 = vsel %vm685_vm4, %v692_v36, %v694_v13 }
  0xcc   : > { %v617_v47 = vrot.slane %v2309_v43, 1  ;;  %v722_v48 = vrot.slane %v2309_v43, 2 }
  0xce   : > { %v618_v55 = vsel %vm580_vm5, %v616_v44, %v617_v47  ;;  %v723_v56 = vsel %vm685_vm4, %v721_v46, %v722_v48  ;;  %v2370_v44 = vld [vmem:[%s2955_s3] ss:$0 sm:$0xff] }
  0xcf   : > { %647 = vrot.lane.b32.xlu1 %v615_v16, %s1967_s23  ;;  %v2318_v52 = vpop.f32.mrf.mxu2  ;;  %v920_v57 = vpop.f32.mrf.mxu1 }
  0xd0   : > { %v1545_v54 = vrot.slane %v2318_v52, 2  ;;  %v1441_v59 = vrot.slane %v2318_v52, 1  ;;  %v1016_v60 = vrot.slane %v920_v57, 1  ;;  %v2331_v63 = vpop.f32.mrf.mxu0  ;;  %v1120_v5 = vrot.slane %v920_v57, 2 }
  0xd2   : > { %v1546_v61 = vsel %vm685_vm4, %v1544_v53, %v1545_v54  ;;  %v1017_v1 = vsel %vm580_vm5, %v1014_v40, %v1016_v60  ;;  %v1442_v3 = vsel %vm580_vm5, %v1440_v58, %v1441_v59  ;;  %v1121_v21 = vsel %vm685_vm4, %v1118_v37, %v1120_v5 }
  0xd3   : > { %1477 = vrot.lane.b32.xlu2 %v1439_v19, %s1967_s23  ;;  %1581 = vrot.lane.b32.xlu0 %v1543_v33, %s1966_s22  ;;  %v537_v8 = vpop.f32.mrf.mxu3  ;;  %v591_v33 = vrot.slane %v2331_v63, 1 }
  0xd4   : > { %v619_v23 = vrot.slane %v537_v8, 1  ;;  %v724_v35 = vrot.slane %v537_v8, 2 }
  0xd6   : > { %v620_v37 = vsel %vm580_vm5, %v617_v47, %v619_v23 }
  0xd7   : > { %625 = vrot.lane.b32.xlu1 %v588_v38, %s1967_s23  ;;  %v1347_v4 = vpop.f32.mrf.mxu2  ;;  %v2343_v19 = vpop.f32.mrf.mxu1  ;;  %v696_v38 = vrot.slane %v2331_v63, 2 }
  0xd8   : > { %v1547_v6 = vrot.slane %v1347_v4, 2  ;;  %v2339_v10 = vpop.f32.mrf.mxu0  ;;  %v1018_v40 = vrot.slane %v2343_v19, 1  ;;  %v1443_v50 = vrot.slane %v1347_v4, 1  ;;  %v1122_v60 = vrot.slane %v2343_v19, 2 }
  0xd9   : > { %v592_v22 = vrot.slane %v2339_v10, 1  ;;  %v697_v18 = vrot.slane %v2339_v10, 2 }
  0xda   : > { %v1548_v16 = vsel %vm685_vm4, %v1545_v54, %v1547_v6 }
  0xdb   : > { %1156 = vrot.lane.b32.xlu2 %v1119_v41, %s1966_s22  ;;  %730 = vrot.lane.b32.xlu0 %v693_v42, %s1966_s22  ;;  %v593_v28 = vsel %vm580_vm5, %v591_v33, %v592_v22  ;;  %v2354_v29 = vpop.f32.mrf.mxu3  ;;  %v725_v42 = vsel %vm685_vm4, %v722_v48, %v724_v35  ;;  %v698_v46 = vsel %vm685_vm4, %v696_v38, %v697_v18 }
  0xdc   : > { %v1038_v48 = vrot.slane %v2354_v29, 1 }
  0xdf   : > { %1052 = vrot.lane.b32.xlu1 %v1015_v49, %s1967_s23  ;;  %v2361_v36 = vpop.f32.mrf.mxu1  ;;  %v2373_v47 = vpop.f32.mrf.mxu2  ;;  %v362_v49 = vadd.f32 %v2370_v44, %v2092_v11  ;;  %v1444_v11 = vsel %vm580_vm5, %v1441_v59, %v1443_v50 }
  0xe0   : > { %v1019_v41 = vrot.slane %v2361_v36, 1  ;;  %v1549_v5 = vrot.slane %v2373_v47, 2  ;;  %v500_v23 = vpop.f32.mrf.mxu0 }
  0xe1   : > { %378 = vst.msk [vmem:[#allocation3] sm:$0xff] %vm303_vm2, %v362_v49  ;;  %v699_v35 = vrot.slane %v500_v23, 2 }
  0xe2   : > { %v1020_v53 = vsel %vm580_vm5, %v1018_v40, %v1019_v41  ;;  %v363_v40 = vadd.f32 %v2370_v44, %v2098_v12 }
  0xe3   : > { %649 = vrot.lane.b32.xlu2 %v618_v55, %s1967_s23  ;;  %754 = vrot.lane.b32.xlu0 %v723_v56, %s1966_s22  ;;  %v2378_v54 = vpop.f32.mrf.mxu3  ;;  %v1142_v56 = vrot.slane %v2354_v29, 2  ;;  %v700_v49 = vsel %vm685_vm4, %v697_v18, %v699_v35 }
  0xe4   : > { %v1039_v55 = vrot.slane %v2378_v54, 1  ;;  %v1143_v57 = vrot.slane %v2378_v54, 2  ;;  %379 = vst.msk [vmem:[#allocation3 + $0x8] sm:$0xff] %vm303_vm2, %v363_v40 }
  0xe6   : > { %v1040_v58 = vsel %vm580_vm5, %v1038_v48, %v1039_v55  ;;  %v1144_v0 = vsel %vm685_vm4, %v1142_v56, %v1143_v57 }
  0xe7   : > { %1583 = vrot.lane.b32.xlu1 %v1546_v61, %s1966_s22  ;;  %v1123_v61 = vrot.slane %v2361_v36, 2  ;;  %v928_v8 = vpop.f32.mrf.mxu1 }
  0xeb   : > { %1054 = vrot.lane.b32.xlu2 %v1017_v1, %s1967_s23  ;;  %1479 = vrot.lane.b32.xlu0 %v1442_v3, %s1967_s23  ;;  %v2393_v1 = vpop.f32.mrf.mxu2  ;;  %v1445_v3 = vrot.slane %v2373_v47, 1  ;;  %v958_v38 = vpop.f32.mrf.mxu3 }
  0xec   : > { %v1446_v59 = vrot.slane %v2393_v1, 1  ;;  %v1550_v6 = vrot.slane %v2393_v1, 2  ;;  %v1041_v48 = vrot.slane %v958_v38, 1 }
  0xee   : > { %v1447_v13 = vsel %vm580_vm5, %v1445_v3, %v1446_v59  ;;  %v1551_v33 = vsel %vm685_vm4, %v1549_v5, %v1550_v6 }
  0xef   : > { %627 = vrot.lane.b32.xlu1 %v590_v7, %s1967_s23  ;;  %v1124_v7 = vsel %vm685_vm4, %v1122_v60, %v1123_v61 }
  0xf3   : > { %1585 = vrot.lane.b32.xlu2 %v1548_v16, %s1966_s22  ;;  %1158 = vrot.lane.b32.xlu0 %v1121_v21, %s1966_s22  ;;  %v374_v16 = vadd.f32 %v2370_v44, %v2135_v26  ;;  %v1021_v21 = vrot.slane %v928_v8, 1  ;;  %v2416_v26 = vpop.f32.mrf.mxu1  ;;  %v2434_v60 = vpop.f32.mrf.mxu3 }
  0xf5   : > { %390 = vst.msk [vmem:[#allocation3 + $0x60] sm:$0xff] %vm303_vm2, %v374_v16 }
  0xf7   : > { %732 = vrot.lane.b32.xlu1 %v695_v24, %s1966_s22 }
  0xfb   : > { %629 = vrot.lane.b32.xlu2 %v593_v28, %s1967_s23  ;;  %651 = vrot.lane.b32.xlu0 %v620_v37, %s1967_s23  ;;  %v594_v28 = vrot.slane %v500_v23, 1  ;;  %v1022_v37 = vsel %vm580_vm5, %v1019_v41, %v1021_v21  ;;  %v2427_v41 = vpop.f32.mrf.mxu0 }
  0xff   : > { %756 = vrot.lane.b32.xlu1 %v725_v42, %s1966_s22  ;;  %v1145_v42 = vrot.slane %v958_v38, 2 }
 0x101   : > { %v1146_v12 = vsel %vm685_vm4, %v1143_v57, %v1145_v42  ;;  %v2440_v57 = vpop.f32.mrf.mxu1  ;;  %v2465_v42 = vpop.f32.mrf.mxu3 }
 0x103   : > { %734 = vrot.lane.b32.xlu2 %v698_v46, %s1966_s22  ;;  %1056 = vrot.lane.b32.xlu0 %v1020_v53, %s1967_s23  ;;  %v595_v46 = vsel %vm580_vm5, %v592_v22, %v594_v28  ;;  %v1125_v53 = vrot.slane %v928_v8, 2  ;;  %v375_v8 = vadd.f32 %v2370_v44, %v2145_v30 }
 0x105   : > { %v1126_v5 = vsel %vm685_vm4, %v1123_v61, %v1125_v53  ;;  %391 = vst.msk [vmem:[#allocation3 + $0x68] sm:$0xff] %vm303_vm2, %v375_v8  ;;  %v1023_v61 = vrot.slane %v2416_v26, 1  ;;  %v1044_v8 = vrot.slane %v2465_v42, 1 }
 0x107   : > { %1481 = vrot.lane.b32.xlu1 %v1444_v11, %s1967_s23  ;;  %v1355_v11 = vpop.f32.mrf.mxu2 }
 0x108   : > { %v1552_v3 = vrot.slane %v1355_v11, 2  ;;  %v1448_v16 = vrot.slane %v1355_v11, 1 }
 0x10a   : > { %v1553_v30 = vsel %vm685_vm4, %v1550_v6, %v1552_v3  ;;  %v1449_v6 = vsel %vm580_vm5, %v1446_v59, %v1448_v16  ;;  %v1043_v3 = vrot.slane %v2434_v60, 1 }
 0x10b   : > { %1072 = vrot.lane.b32.xlu2 %v1040_v58, %s1967_s23  ;;  %1176 = vrot.lane.b32.xlu0 %v1144_v0, %s1966_s22  ;;  %v540_v58 = vld [vmem:[#allocation3] sm:$0xff] }
 0x10d   : > { %v1049_v4 = vpop.permute.xlu2 %1048 }
 0x10e   : > { %v1096_v23 = vadd.f32 %v1049_v4, %v2210_v14 }
 0x10f   : > { %1160 = vrot.lane.b32.xlu1 %v1124_v7, %s1966_s22  ;;  %v1042_v7 = vsel %vm580_vm5, %v1039_v55, %v1041_v48  ;;  %v1024_v55 = vrot.slane %v2440_v57, 1  ;;  %v2455_v28 = vpop.f32.mrf.mxu2  ;;  %v1147_v48 = vrot.slane %v2434_v60, 2 }
 0x111   : > { %v1025_v40 = vsel %vm580_vm5, %v1023_v61, %v1024_v55 }
 0x113   : > { %1483 = vrot.lane.b32.xlu2 %v1447_v13, %s1967_s23  ;;  %1587 = vrot.lane.b32.xlu0 %v1551_v33, %s1966_s22  ;;  %v2451_v33 = vpop.f32.mrf.mxu0 }
 0x114   : > { %v702_v38 = vrot.slane %v2451_v33, 2 }
 0x115   : > { %v2412_v24 = vpop.permute.xlu2 %1579 }
 0x117   : > { %1058 = vrot.lane.b32.xlu1 %v1022_v37, %s1967_s23  ;;  %v701_v37 = vrot.slane %v2427_v41, 2  ;;  %v2493_v16 = vpop.f32.mrf.mxu2 }
 0x119   : > { %v703_v59 = vsel %vm685_vm4, %v701_v37, %v702_v38  ;;  %v1554_v37 = vrot.slane %v2455_v28, 2 }
 0x11b   : > { %631 = vrot.lane.b32.xlu2 %v595_v46, %s1967_s23  ;;  %736 = vrot.lane.b32.xlu0 %v700_v49, %s1966_s22  ;;  %v596_v46 = vrot.slane %v2427_v41, 1 }
 0x11d   : > { %v2429_v50 = vpop.permute.xlu2 %728  ;;  %v622_v56 = vpop.permute.xlu0 %621 }
 0x11e   : > { %v727_v22 = vpop.permute.xlu1 %726  ;;  %v669_v18 = vadd.f32 %v622_v56, %v2205_v9  ;;  %v1148_v56 = vrot.slane %v2465_v42, 2 }
 0x11f   : > { %1178 = vrot.lane.b32.xlu1 %v1146_v12, %s1966_s22  ;;  %v597_v12 = vrot.slane %v2451_v33, 1 }
 0x120   : > { %v774_v0 = vadd.f32 %v727_v22, %v669_v18  ;;  %v344_v22 = vld [vmem:[%s2087_s16 + $0x10] sm:$0xff] }
 0x122   : > { %v790_v13 = vadd.f32 %v774_v0, %v540_v58  ;;  %v364_v58 = vadd.f32 %v2370_v44, %v344_v22  ;;  %v552_v0 = vld [vmem:[#allocation3 + $0x60] sm:$0xff] }
 0x123   : > { %1162 = vrot.lane.b32.xlu2 %v1126_v5, %s1966_s22  ;;  %1074 = vrot.lane.b32.xlu0 %v1042_v7, %s1967_s23 }
 0x124   : > { %806 = vst.msk [vmem:[#allocation3] sm:$0xff] %vm303_vm2, %v790_v13  ;;  %v1149_v13 = vsel %vm685_vm4, %v1147_v48, %v1148_v56  ;;  %v346_v48 = vld [vmem:[%s2087_s16 + $0x20] sm:$0xff] }
 0x125   : > { %v2446_v9 = vpop.permute.xlu2 %752  ;;  %v1153_v21 = vpop.permute.xlu0 %1152  ;;  %380 = vst.msk [vmem:[#allocation3 + $0x10] sm:$0xff] %vm303_vm2, %v364_v58  ;;  %v1450_v58 = vrot.slane %v2455_v28, 1 }
 0x126   : > { %v1200_v14 = vadd.f32 %v1153_v21, %v1096_v23  ;;  %v1127_v21 = vrot.slane %v2416_v26, 2 }
 0x127   : > { %1589 = vrot.lane.b32.xlu1 %v1553_v30, %s1966_s22 }
 0x129   : > { %v751_v35 = vpop.permute.xlu1 %750 }
 0x12b   : > { %1060 = vrot.lane.b32.xlu2 %v1025_v40, %s1967_s23  ;;  %1485 = vrot.lane.b32.xlu0 %v1449_v6, %s1967_s23  ;;  %v968_v4 = vld [vmem:[#allocation3] sm:$0xff]  ;;  %v1555_v40 = vrot.slane %v2493_v16, 2 }
 0x12c   : > { %v1216_v49 = vadd.f32 %v1200_v14, %v968_v4  ;;  %v1045_v14 = vsel %vm580_vm5, %v1043_v3, %v1044_v8  ;;  %v507_v3 = vpop.f32.mrf.mxu0 }
 0x12d   : > { %v2470_v53 = vpop.permute.xlu2 %1477  ;;  %v646_v11 = vpop.permute.xlu0 %645 }
 0x12e   : > { %1232 = vst.msk [vmem:[#allocation3] sm:$0xff] %vm303_vm2, %v1216_v49  ;;  %v681_v18 = vadd.f32 %v646_v11, %v2221_v25  ;;  %v598_v25 = vsel %vm580_vm5, %v596_v46, %v597_v12  ;;  %v376_v49 = vadd.f32 %v2370_v44, %v2176_v51  ;;  %v366_v11 = vadd.f32 %v2370_v44, %v346_v48 }
 0x12f   : > { %738 = vrot.lane.b32.xlu1 %v703_v59, %s1966_s22  ;;  %v541_v59 = vld [vmem:[#allocation3 + $0x8] sm:$0xff] }
 0x130   : > { %v786_v7 = vadd.f32 %v751_v35, %v681_v18  ;;  %392 = vst.msk [vmem:[#allocation3 + $0x70] sm:$0xff] %vm303_vm2, %v376_v49 }
 0x131   : > { %v1476_v5 = vpop.permute.xlu1 %1475  ;;  %382 = vst.msk [vmem:[#allocation3 + $0x20] sm:$0xff] %vm303_vm2, %v366_v11 }
 0x132   : > { %v1523_v61 = vadd.f32 %v1476_v5, %v2231_v31  ;;  %v802_v30 = vadd.f32 %v786_v7, %v552_v0  ;;  %v1128_v31 = vrot.slane %v2440_v57, 2  ;;  %v1451_v0 = vrot.slane %v2493_v16, 1 }
 0x133   : > { %1180 = vrot.lane.b32.xlu2 %v1149_v13, %s1966_s22  ;;  %633 = vrot.lane.b32.xlu0 %v598_v25, %s1967_s23  ;;  %v704_v13 = vrot.slane %v507_v3, 2 }
 0x134   : > { %v1627_v23 = vadd.f32 %v2412_v24, %v1523_v61  ;;  %818 = vst.msk [vmem:[#allocation3 + $0x60] sm:$0xff] %vm303_vm2, %v802_v30  ;;  %v1129_v51 = vsel %vm685_vm4, %v1127_v21, %v1128_v31  ;;  %v1452_v25 = vsel %vm580_vm5, %v1450_v58, %v1451_v0 }
 0x135   : > { %v2500_v35 = vpop.permute.xlu2 %1156  ;;  %v1395_v6 = vld [vmem:[#allocation3] sm:$0xff]  ;;  %v624_v4 = vpop.permute.xlu0 %623 }
 0x136   : > { %v1643_v46 = vadd.f32 %v1627_v23, %v1395_v6  ;;  %v670_v24 = vadd.f32 %v624_v4, %v2212_v15  ;;  %v1556_v15 = vsel %vm685_vm4, %v1554_v37, %v1555_v40  ;;  %v599_v6 = vrot.slane %v507_v3, 1 }
 0x137   : > { %1076 = vrot.lane.b32.xlu1 %v1045_v14, %s1967_s23  ;;  %v705_v14 = vsel %vm685_vm4, %v702_v38, %v704_v13 }
 0x138   : > { %1659 = vst.msk [vmem:[#allocation3] sm:$0xff] %vm303_vm2, %v1643_v46  ;;  %v775_v18 = vadd.f32 %v2429_v50, %v670_v24  ;;  %v935_v50 = vpop.f32.mrf.mxu1  ;;  %v965_v24 = vpop.f32.mrf.mxu3 }
 0x139   : > { %v1155_v22 = vpop.permute.xlu1 %1154  ;;  %v1026_v61 = vrot.slane %v935_v50, 1  ;;  %v1046_v38 = vrot.slane %v965_v24, 1  ;;  %v1130_v13 = vrot.slane %v935_v50, 2 }
 0x13a   : > { %v791_v5 = vadd.f32 %v775_v18, %v541_v59 }
 0x13b   : > { %1591 = vrot.lane.b32.xlu2 %v1556_v15, %s1966_s22  ;;  %1164 = vrot.lane.b32.xlu0 %v1129_v51, %s1966_s22  ;;  %v1027_v46 = vsel %vm580_vm5, %v1024_v55, %v1026_v61  ;;  %v600_v55 = vsel %vm580_vm5, %v597_v12, %v599_v6  ;;  %v345_v51 = vld [vmem:[%s2087_s16 + $0x18] sm:$0xff]  ;;  %v1047_v12 = vsel %vm580_vm5, %v1044_v8, %v1046_v38 }
 0x13c   : > { %807 = vst.msk [vmem:[#allocation3 + $0x8] sm:$0xff] %vm303_vm2, %v791_v5 }
 0x13d   : > { %v2529_v7 = vpop.permute.xlu2 %649  ;;  %v1051_v30 = vpop.permute.xlu0 %1050 }
 0x13e   : > { %v1097_v21 = vadd.f32 %v1051_v30, %v2233_v32  ;;  %v553_v32 = vld [vmem:[#allocation3 + $0x68] sm:$0xff]  ;;  %v1362_v30 = vpop.f32.mrf.mxu2 }
 0x13f   : > { %1487 = vrot.lane.b32.xlu1 %v1452_v25, %s1967_s23  ;;  %v1675_v23 = vld [vmem:[#allocation3] sm:$0xff]  ;;  %v1524_v25 = vadd.f32 %v2470_v53, %v2250_v45  ;;  %v1557_v8 = vrot.slane %v1362_v30, 2 }
 0x140   : > { %1691 = vst.msk [vmem:[%s2536_s28] sm:$0xff] %vm303_vm2, %v1675_v23  ;;  %v1201_v49 = vadd.f32 %v1155_v22, %v1097_v21  ;;  %v2561_v3 = vpop.f32.mrf.mxu1  ;;  %v2567_v22 = vpop.f32.mrf.mxu0 }
 0x141   : > { %v648_v37 = vpop.permute.xlu1 %647  ;;  %v2586_v53 = vpop.f32.mrf.mxu3 }
 0x142   : > { %v682_v4 = vadd.f32 %v648_v37, %v2241_v39  ;;  %v1150_v39 = vrot.slane %v965_v24, 2  ;;  %v1453_v37 = vrot.slane %v1362_v30, 1  ;;  %v357_v24 = vld [vmem:[%s2087_s16 + $0x78] sm:$0xff] }
 0x143   : > { %740 = vrot.lane.b32.xlu2 %v705_v14, %s1966_s22  ;;  %1062 = vrot.lane.b32.xlu0 %v1027_v46, %s1967_s23  ;;  %v969_v59 = vld [vmem:[#allocation3 + $0x8] sm:$0xff]  ;;  %v542_v14 = vld [vmem:[#allocation3 + $0x10] sm:$0xff]  ;;  %v377_v38 = vadd.f32 %v2370_v44, %v357_v24  ;;  %v544_v24 = vld [vmem:[#allocation3 + $0x20] sm:$0xff] }
 0x144   : > { %v787_v48 = vadd.f32 %v2446_v9, %v682_v4  ;;  %v1217_v11 = vadd.f32 %v1201_v49, %v969_v59  ;;  %v365_v9 = vadd.f32 %v2370_v44, %v345_v51  ;;  %v1151_v61 = vsel %vm685_vm4, %v1148_v56, %v1150_v39 }
 0x145   : > { %v2555_v18 = vpop.permute.xlu2 %1054  ;;  %v1582_v15 = vpop.permute.xlu0 %1581  ;;  %v1131_v56 = vsel %vm685_vm4, %v1128_v31, %v1130_v13  ;;  %v1454_v31 = vsel %vm580_vm5, %v1451_v0, %v1453_v37  ;;  %393 = vst.msk [vmem:[#allocation3 + $0x78] sm:$0xff] %vm303_vm2, %v377_v38  ;;  %v1465_v37 = vrot.slane %v2586_v53, 1 }
 0x146   : > { %v803_v58 = vadd.f32 %v787_v48, %v553_v32  ;;  %1233 = vst.msk [vmem:[#allocation3 + $0x8] sm:$0xff] %vm303_vm2, %v1217_v11  ;;  %v1628_v21 = vadd.f32 %v1582_v15, %v1524_v25  ;;  %v1558_v11 = vsel %vm685_vm4, %v1555_v40, %v1557_v8  ;;  %v683_v40 = vadd.f32 %v2529_v7, %v2286_v20 }
 0x147   : > { %635 = vrot.lane.b32.xlu1 %v600_v55, %s1967_s23  ;;  %381 = vst.msk [vmem:[#allocation3 + $0x18] sm:$0xff] %vm303_vm2, %v365_v9  ;;  %v601_v55 = vrot.slane %v2567_v22, 1  ;;  %v706_v9 = vrot.slane %v2567_v22, 2 }
 0x148   : > { %819 = vst.msk [vmem:[#allocation3 + $0x68] sm:$0xff] %vm303_vm2, %v803_v58  ;;  %v2591_v32 = vpop.f32.mrf.mxu1  ;;  %v2602_v39 = vpop.f32.mrf.mxu0 }
 0x149   : > { %v626_v5 = vpop.permute.xlu1 %625  ;;  %v1029_v59 = vrot.slane %v2591_v32, 1  ;;  %v2604_v58 = vpop.f32.mrf.mxu2  ;;  %v602_v0 = vrot.slane %v2602_v39, 1 }
 0x14a   : > { %v671_v50 = vadd.f32 %v626_v5, %v2267_v62  ;;  %v1028_v62 = vrot.slane %v2561_v3, 1  ;;  %v707_v5 = vrot.slane %v2602_v39, 2 }
 0x14b   : > { %1078 = vrot.lane.b32.xlu2 %v1047_v12, %s1967_s23  ;;  %1182 = vrot.lane.b32.xlu0 %v1151_v61, %s1966_s22  ;;  %v554_v12 = vld [vmem:[#allocation3 + $0x70] sm:$0xff]  ;;  %v603_v20 = vsel %vm580_vm5, %v601_v55, %v602_v0 }
 0x14c   : > { %v1030_v13 = vsel %vm580_vm5, %v1028_v62, %v1029_v59 }
 0x14d   : > { %v2581_v23 = vpop.permute.xlu2 %1585  ;;  %v1396_v6 = vld [vmem:[#allocation3 + $0x8] sm:$0xff]  ;;  %v731_v45 = vpop.permute.xlu0 %730 }
 0x14e   : > { %v1644_v4 = vadd.f32 %v1628_v21, %v1396_v6  ;;  %v776_v46 = vadd.f32 %v731_v45, %v671_v50  ;;  %v1132_v45 = vrot.slane %v2561_v3, 2 }
 0x14f   : > { %1166 = vrot.lane.b32.xlu1 %v1131_v56, %s1966_s22  ;;  %v708_v56 = vsel %vm685_vm4, %v706_v9, %v707_v5 }
 0x150   : > { %1660 = vst.msk [vmem:[#allocation3 + $0x8] sm:$0xff] %vm303_vm2, %v1644_v4  ;;  %v792_v49 = vadd.f32 %v776_v46, %v542_v14  ;;  %v1133_v4 = vrot.slane %v2591_v32, 2 }
 0x151   : > { %v1053_v48 = vpop.permute.xlu1 %1052  ;;  %v2641_v46 = vpop.f32.mrf.mxu2 }
 0x152   : > { %808 = vst.msk [vmem:[#allocation3 + $0x10] sm:$0xff] %vm303_vm2, %v792_v49  ;;  %v1098_v15 = vadd.f32 %v1053_v48, %v2271_v2  ;;  %v2626_v2 = vpop.f32.mrf.mxu3  ;;  %v1455_v49 = vrot.slane %v2604_v58, 1  ;;  %v1456_v48 = vrot.slane %v2641_v46, 1  ;;  %v1560_v9 = vrot.slane %v2641_v46, 2 }
 0x153   : > { %1489 = vrot.lane.b32.xlu2 %v1454_v31, %s1967_s23  ;;  %1593 = vrot.lane.b32.xlu0 %v1558_v11, %s1966_s22  ;;  %v1466_v8 = vrot.slane %v2626_v2, 1 }
 0x154   : > { %v1202_v7 = vadd.f32 %v2500_v35, %v1098_v15 }
 0x155   : > { %v630_v51 = vpop.permute.xlu2 %629  ;;  %v755_v61 = vpop.permute.xlu0 %754  ;;  %v1467_v11 = vsel %vm580_vm5, %v1465_v37, %v1466_v8 }
 0x156   : > { %v788_v25 = vadd.f32 %v755_v61, %v683_v40  ;;  %v673_v35 = vadd.f32 %v630_v51, %v2331_v63  ;;  %v943_v40 = vpop.f32.mrf.mxu1  ;;  %v1559_v51 = vrot.slane %v2604_v58, 2  ;;  %v515_v61 = vpop.f32.mrf.mxu0 }
 0x157   : > { %1064 = vrot.lane.b32.xlu1 %v1030_v13, %s1967_s23  ;;  %v1676_v30 = vld [vmem:[#allocation3 + $0x8] sm:$0xff]  ;;  %v1134_v13 = vsel %vm685_vm4, %v1132_v45, %v1133_v4 }
 0x158   : > { %1692 = vst.msk [vmem:[%s2536_s28 + $0x8] sm:$0xff] %vm303_vm2, %v1676_v30  ;;  %v804_v21 = vadd.f32 %v788_v25, %v554_v12  ;;  %v1457_v12 = vsel %vm580_vm5, %v1455_v49, %v1456_v48  ;;  %v1561_v37 = vsel %vm685_vm4, %v1559_v51, %v1560_v9  ;;  %v347_v51 = vld [vmem:[%s2087_s16 + $0x28] sm:$0xff] }
 0x159   : > { %v1584_v50 = vpop.permute.xlu1 %1583  ;;  %v970_v6 = vld [vmem:[#allocation3 + $0x10] sm:$0xff] }
 0x15a   : > { %v1218_v14 = vadd.f32 %v1202_v7, %v970_v6  ;;  %820 = vst.msk [vmem:[#allocation3 + $0x70] sm:$0xff] %vm303_vm2, %v804_v21  ;;  %v1031_v7 = vrot.slane %v943_v40, 1  ;;  %v604_v21 = vrot.slane %v515_v61, 1 }
 0x15b   : > { %637 = vrot.lane.b32.xlu2 %v603_v20, %s1967_s23  ;;  %742 = vrot.lane.b32.xlu0 %v708_v56, %s1966_s22  ;;  %v2668_v56 = vpop.f32.mrf.mxu3 }
 0x15c   : > { %1234 = vst.msk [vmem:[#allocation3 + $0x10] sm:$0xff] %vm303_vm2, %v1218_v14 }
 0x15d   : > { %v735_v62 = vpop.permute.xlu2 %734  ;;  %v1480_v63 = vpop.permute.xlu0 %1479 }
 0x15e   : > { %v778_v31 = vadd.f32 %v735_v62, %v673_v35  ;;  %v1525_v38 = vadd.f32 %v1480_v63, %v2297_v34  ;;  %v2671_v14 = vpop.f32.mrf.mxu1  ;;  %v543_v35 = vld [vmem:[#allocation3 + $0x18] sm:$0xff]  ;;  %v1032_v62 = vsel %vm580_vm5, %v1029_v59, %v1031_v7  ;;  %v2681_v63 = vpop.f32.mrf.mxu0 }
 0x15f   : > { %1499 = vrot.lane.b32.xlu1 %v1467_v11, %s1967_s23  ;;  %v1135_v11 = vrot.slane %v943_v40, 2 }
 0x160   : > { %v794_v55 = vadd.f32 %v778_v31, %v544_v24  ;;  %v1629_v34 = vadd.f32 %v1584_v50, %v1525_v38  ;;  %v709_v24 = vrot.slane %v515_v61, 2  ;;  %v605_v31 = vsel %vm580_vm5, %v602_v0, %v604_v21 }
 0x161   : > { %v628_v15 = vpop.permute.xlu1 %627 }
 0x162   : > { %810 = vst.msk [vmem:[#allocation3 + $0x20] sm:$0xff] %vm303_vm2, %v794_v55  ;;  %v672_v50 = vadd.f32 %v628_v15, %v2283_v17  ;;  %v1468_v55 = vrot.slane %v2668_v56, 1  ;;  %v710_v59 = vsel %vm685_vm4, %v707_v5, %v709_v24  ;;  %v1099_v5 = vadd.f32 %v2555_v18, %v2292_v27 }
 0x163   : > { %1168 = vrot.lane.b32.xlu2 %v1134_v13, %s1966_s22  ;;  %1491 = vrot.lane.b32.xlu0 %v1457_v12, %s1967_s23  ;;  %v1397_v25 = vld [vmem:[#allocation3 + $0x10] sm:$0xff]  ;;  %v1370_v13 = vpop.f32.mrf.mxu2  ;;  %v367_v12 = vadd.f32 %v2370_v44, %v347_v51  ;;  %v2696_v61 = vpop.f32.mrf.mxu3  ;;  %v1033_v27 = vrot.slane %v2671_v14, 1  ;;  %v711_v51 = vrot.slane %v2681_v63, 2 }
 0x164   : > { %v1645_v30 = vadd.f32 %v1629_v34, %v1397_v25  ;;  %v555_v34 = vld [vmem:[#allocation3 + $0x78] sm:$0xff]  ;;  %v1458_v7 = vrot.slane %v1370_v13, 1 }
 0x165   : > { %v2661_v20 = vpop.permute.xlu2 %1072  ;;  %v1159_v6 = vpop.permute.xlu0 %1158  ;;  %383 = vst.msk [vmem:[#allocation3 + $0x28] sm:$0xff] %vm303_vm2, %v367_v12 }
 0x166   : > { %1661 = vst.msk [vmem:[#allocation3 + $0x10] sm:$0xff] %vm303_vm2, %v1645_v30  ;;  %v1136_v30 = vsel %vm685_vm4, %v1133_v4, %v1135_v11  ;;  %v1562_v4 = vrot.slane %v1370_v13, 2 }
 0x167   : > { %1595 = vrot.lane.b32.xlu1 %v1561_v37, %s1966_s22  ;;  %v2707_v37 = vpop.f32.mrf.mxu1 }
 0x169   : > { %v733_v45 = vpop.permute.xlu1 %732 }
 0x16a   : > { %v777_v49 = vadd.f32 %v733_v45, %v672_v50  ;;  %v1203_v50 = vadd.f32 %v1159_v6, %v1099_v5 }
 0x16b   : > { %1066 = vrot.lane.b32.xlu2 %v1032_v62, %s1967_s23  ;;  %639 = vrot.lane.b32.xlu0 %v605_v31, %s1967_s23  ;;  %v1034_v62 = vrot.slane %v2707_v37, 1  ;;  %v2719_v31 = vpop.f32.mrf.mxu0  ;;  %v2723_v6 = vpop.f32.mrf.mxu2 }
 0x16c   : > { %v793_v17 = vadd.f32 %v777_v49, %v543_v35  ;;  %v712_v13 = vrot.slane %v2719_v31, 2 }
 0x16d   : > { %v2683_v38 = vpop.permute.xlu2 %1483  ;;  %v1677_v15 = vld [vmem:[#allocation3 + $0x10] sm:$0xff]  ;;  %v652_v0 = vpop.permute.xlu0 %651 }
 0x16e   : > { %809 = vst.msk [vmem:[#allocation3 + $0x18] sm:$0xff] %vm303_vm2, %v793_v17  ;;  %v684_v40 = vadd.f32 %v652_v0, %v2309_v43  ;;  %v1469_v43 = vsel %vm580_vm5, %v1466_v8, %v1468_v55  ;;  %v1459_v8 = vsel %vm580_vm5, %v1456_v48, %v1458_v7  ;;  %v1563_v17 = vsel %vm685_vm4, %v1560_v9, %v1562_v4  ;;  %v2734_v0 = vpop.f32.mrf.mxu3 }
 0x16f   : > { %1693 = vst.msk [vmem:[%s2536_s28 + $0x10] sm:$0xff] %vm303_vm2, %v1677_v15  ;;  %744 = vrot.lane.b32.xlu1 %v710_v59, %s1966_s22  ;;  %v606_v55 = vrot.slane %v2681_v63, 1  ;;  %v607_v15 = vrot.slane %v2719_v31, 1  ;;  %v1035_v59 = vsel %vm580_vm5, %v1033_v27, %v1034_v62  ;;  %v1108_v9 = vadd.f32 %v2661_v20, %v2354_v29 }
 0x170   : > { %v1471_v12 = vrot.slane %v2734_v0, 1  ;;  %v1138_v4 = vrot.slane %v2707_v37, 2 }
 0x171   : > { %v757_v25 = vpop.permute.xlu1 %756 }
 0x172   : > { %v789_v21 = vadd.f32 %v757_v25, %v684_v40  ;;  %v608_v25 = vsel %vm580_vm5, %v606_v55, %v607_v15 }
 0x173   : > { %1501 = vrot.lane.b32.xlu2 %v1469_v43, %s1967_s23  ;;  %1170 = vrot.lane.b32.xlu0 %v1136_v30, %s1966_s22  ;;  %v980_v43 = vld [vmem:[#allocation3 + $0x60] sm:$0xff] }
 0x174   : > { %v805_v35 = vadd.f32 %v789_v21, %v555_v34  ;;  %v1137_v21 = vrot.slane %v2671_v14, 2 }
 0x175   : > { %v971_v45 = vld [vmem:[#allocation3 + $0x18] sm:$0xff]  ;;  %v2711_v24 = vpop.permute.xlu2 %631  ;;  %v1057_v49 = vpop.permute.xlu0 %1056 }
 0x176   : > { %v1219_v18 = vadd.f32 %v1203_v50, %v971_v45  ;;  %821 = vst.msk [vmem:[#allocation3 + $0x78] sm:$0xff] %vm303_vm2, %v805_v35  ;;  %v1100_v20 = vadd.f32 %v1057_v49, %v2343_v19  ;;  %v522_v19 = vpop.f32.mrf.mxu0 }
 0x177   : > { %1493 = vrot.lane.b32.xlu1 %v1459_v8, %s1967_s23  ;;  %v972_v8 = vld [vmem:[#allocation3 + $0x20] sm:$0xff] }
 0x178   : > { %1235 = vst.msk [vmem:[#allocation3 + $0x18] sm:$0xff] %vm303_vm2, %v1219_v18  ;;  %v2759_v18 = vpop.f32.mrf.mxu2 }
 0x179   : > { %v1482_v11 = vpop.permute.xlu1 %1481  ;;  %v1461_v55 = vrot.slane %v2759_v18, 1 }
 0x17a   : > { %v1526_v48 = vadd.f32 %v1482_v11, %v2318_v52  ;;  %v1470_v52 = vrot.slane %v2696_v61, 1  ;;  %v1460_v11 = vrot.slane %v2723_v6, 1 }
 0x17b   : > { %1597 = vrot.lane.b32.xlu2 %v1563_v17, %s1966_s22  ;;  %1068 = vrot.lane.b32.xlu0 %v1035_v59, %s1967_s23  ;;  %v1139_v59 = vsel %vm685_vm4, %v1137_v21, %v1138_v4  ;;  %v1564_v21 = vrot.slane %v2723_v6, 2 }
 0x17c   : > { %v1630_v34 = vadd.f32 %v2581_v23, %v1526_v48  ;;  %v713_v23 = vsel %vm685_vm4, %v711_v51, %v712_v13  ;;  %v1472_v27 = vsel %vm580_vm5, %v1470_v52, %v1471_v12  ;;  %v714_v48 = vrot.slane %v522_v19, 2  ;;  %v950_v51 = vpop.f32.mrf.mxu1  ;;  %v348_v52 = vld [vmem:[%s2087_s16 + $0x30] sm:$0xff] }
 0x17d   : > { %v2742_v40 = vpop.permute.xlu2 %1162  ;;  %v1177_v30 = vpop.permute.xlu0 %1176 }
 0x17e   : > { %v1212_v29 = vadd.f32 %v1177_v30, %v1108_v9  ;;  %v368_v30 = vadd.f32 %v2370_v44, %v348_v52 }
 0x17f   : > { %v1398_v5 = vld [vmem:[#allocation3 + $0x18] sm:$0xff]  ;;  %641 = vrot.lane.b32.xlu1 %v608_v25, %s1967_s23 }
 0x180   : > { %v1646_v7 = vadd.f32 %v1630_v34, %v1398_v5  ;;  %v1228_v50 = vadd.f32 %v1212_v29, %v980_v43  ;;  %v1527_v5 = vadd.f32 %v2683_v38, %v2373_v47  ;;  %v1036_v29 = vrot.slane %v950_v51, 1  ;;  %384 = vst.msk [vmem:[#allocation3 + $0x30] sm:$0xff] %vm303_vm2, %v368_v30 }
 0x181   : > { %v1161_v35 = vpop.permute.xlu1 %1160  ;;  %v674_v47 = vadd.f32 %v2711_v24, %v2339_v10 }
 0x182   : > { %1662 = vst.msk [vmem:[#allocation3 + $0x18] sm:$0xff] %vm303_vm2, %v1646_v7  ;;  %v1204_v45 = vadd.f32 %v1161_v35, %v1100_v20  ;;  %v1462_v20 = vsel %vm580_vm5, %v1460_v11, %v1461_v55  ;;  %v715_v7 = vsel %vm685_vm4, %v712_v13, %v714_v48  ;;  %v1565_v35 = vrot.slane %v2759_v18, 2 }
 0x183   : > { %746 = vrot.lane.b32.xlu2 %v713_v23, %s1966_s22  ;;  %1244 = vst.msk [vmem:[#allocation3 + $0x60] sm:$0xff] %vm303_vm2, %v1228_v50  ;;  %1503 = vrot.lane.b32.xlu0 %v1472_v27, %s1967_s23  ;;  %v609_v23 = vrot.slane %v522_v19, 1  ;;  %v1037_v13 = vsel %vm580_vm5, %v1034_v62, %v1036_v29  ;;  %v545_v27 = vld [vmem:[#allocation3 + $0x28] sm:$0xff] }
 0x184   : > { %v1220_v49 = vadd.f32 %v1204_v45, %v972_v8  ;;  %v1566_v62 = vsel %vm685_vm4, %v1564_v21, %v1565_v35 }
 0x185   : > { %v2764_v17 = vpop.permute.xlu2 %1060  ;;  %v1588_v9 = vpop.permute.xlu0 %1587  ;;  %v610_v19 = vsel %vm580_vm5, %v607_v15, %v609_v23 }
 0x186   : > { %1236 = vst.msk [vmem:[#allocation3 + $0x20] sm:$0xff] %vm303_vm2, %v1220_v49  ;;  %v1631_v43 = vadd.f32 %v1588_v9, %v1527_v5  ;;  %v2795_v49 = vpop.f32.mrf.mxu3 }
 0x187   : > { %1172 = vrot.lane.b32.xlu1 %v1139_v59, %s1966_s22  ;;  %v1473_v48 = vrot.slane %v2795_v49, 1  ;;  %v1377_v59 = vpop.f32.mrf.mxu2 }
 0x188   : > { %v1463_v30 = vrot.slane %v1377_v59, 1 }
 0x189   : > { %v1678_v34 = vld [vmem:[#allocation3 + $0x18] sm:$0xff]  ;;  %v1059_v25 = vpop.permute.xlu1 %1058  ;;  %v1474_v15 = vsel %vm580_vm5, %v1471_v12, %v1473_v48  ;;  %v1575_v48 = vrot.slane %v2734_v0, 2 }
 0x18a   : > { %1694 = vst.msk [vmem:[%s2536_s28 + $0x18] sm:$0xff] %vm303_vm2, %v1678_v34  ;;  %v1101_v9 = vadd.f32 %v1059_v25, %v2361_v36  ;;  %v1140_v34 = vrot.slane %v950_v51, 2 }
 0x18b   : > { %1495 = vrot.lane.b32.xlu2 %v1462_v20, %s1967_s23  ;;  %748 = vrot.lane.b32.xlu0 %v715_v7, %s1966_s22  ;;  %v349_v7 = vld [vmem:[%s2087_s16 + $0x38] sm:$0xff] }
 0x18c   : > { %v369_v51 = vadd.f32 %v2370_v44, %v349_v7  ;;  %v1141_v12 = vsel %vm685_vm4, %v1138_v4, %v1140_v34  ;;  %v1570_v4 = vrot.slane %v2626_v2, 2  ;;  %v1577_v34 = vrot.slane %v2795_v49, 2 }
 0x18d   : > { %v1399_v38 = vld [vmem:[#allocation3 + $0x20] sm:$0xff]  ;;  %v2789_v50 = vpop.permute.xlu2 %1180  ;;  %v737_v8 = vpop.permute.xlu0 %736 }
 0x18e   : > { %v1647_v45 = vadd.f32 %v1631_v43, %v1399_v38  ;;  %v779_v11 = vadd.f32 %v737_v8, %v674_v47  ;;  %v1205_v43 = vadd.f32 %v2742_v40, %v1101_v9  ;;  %v1567_v47 = vrot.slane %v1377_v59, 2  ;;  %v981_v38 = vld [vmem:[#allocation3 + $0x68] sm:$0xff]  ;;  %385 = vst.msk [vmem:[#allocation3 + $0x38] sm:$0xff] %vm303_vm2, %v369_v51 }
 0x18f   : > { %1070 = vrot.lane.b32.xlu1 %v1037_v13, %s1967_s23  ;;  %v1569_v13 = vrot.slane %v2586_v53, 2  ;;  %v1578_v7 = vsel %vm685_vm4, %v1575_v48, %v1577_v34 }
 0x190   : > { %1663 = vst.msk [vmem:[#allocation3 + $0x20] sm:$0xff] %vm303_vm2, %v1647_v45  ;;  %v795_v24 = vadd.f32 %v779_v11, %v545_v27  ;;  %v1572_v27 = vrot.slane %v2668_v56, 2 }
 0x191   : > { %v1179_v10 = vpop.permute.xlu1 %1178 }
 0x192   : > { %811 = vst.msk [vmem:[#allocation3 + $0x28] sm:$0xff] %vm303_vm2, %v795_v24  ;;  %v1574_v24 = vrot.slane %v2696_v61, 2 }
 0x193   : > { %643 = vrot.lane.b32.xlu2 %v610_v19, %s1967_s23  ;;  %1599 = vrot.lane.b32.xlu0 %v1566_v62, %s1966_s22  ;;  %v1571_v19 = vsel %vm685_vm4, %v1569_v13, %v1570_v4  ;;  %v1573_v62 = vsel %vm685_vm4, %v1570_v4, %v1572_v27 }
 0x195   : > { %v2808_v52 = vpop.permute.xlu2 %1591  ;;  %v1075_v5 = vpop.permute.xlu0 %1074 }
 0x196   : > { %v1109_v20 = vadd.f32 %v1075_v5, %v2378_v54  ;;  %v1464_v54 = vsel %vm580_vm5, %v1461_v55, %v1463_v30  ;;  %v1568_v55 = vsel %vm685_vm4, %v1565_v35, %v1567_v47  ;;  %v546_v5 = vld [vmem:[#allocation3 + $0x30] sm:$0xff] }
 0x197   : > { %v1679_v29 = vld [vmem:[#allocation3 + $0x20] sm:$0xff]  ;;  %1505 = vrot.lane.b32.xlu1 %v1474_v15, %s1967_s23 }
 0x198   : > { %1695 = vst.msk [vmem:[%s2536_s28 + $0x20] sm:$0xff] %vm303_vm2, %v1679_v29  ;;  %v1213_v25 = vadd.f32 %v1179_v10, %v1109_v20 }
 0x199   : > { %v1590_v36 = vpop.permute.xlu1 %1589  ;;  %v973_v21 = vld [vmem:[#allocation3 + $0x28] sm:$0xff] }
 0x19a   : > { %v1221_v23 = vadd.f32 %v1205_v43, %v973_v21  ;;  %v1229_v45 = vadd.f32 %v1213_v25, %v981_v38  ;;  %v982_v25 = vld [vmem:[#allocation3 + $0x70] sm:$0xff] }
 0x19b   : > { %1174 = vrot.lane.b32.xlu2 %v1141_v12, %s1966_s22  ;;  %1497 = vrot.lane.b32.xlu0 %v1464_v54, %s1967_s23  ;;  %v350_v12 = vld [vmem:[%s2087_s16 + $0x40] sm:$0xff] }
 0x19c   : > { %1237 = vst.msk [vmem:[#allocation3 + $0x28] sm:$0xff] %vm303_vm2, %v1221_v23  ;;  %v370_v38 = vadd.f32 %v2370_v44, %v350_v12 }
 0x19d   : > { %v741_v40 = vpop.permute.xlu2 %740  ;;  %1245 = vst.msk [vmem:[#allocation3 + $0x68] sm:$0xff] %vm303_vm2, %v1229_v45  ;;  %v1486_v8 = vpop.permute.xlu0 %1485 }
 0x19e   : > { %v1528_v11 = vadd.f32 %v1486_v8, %v2393_v1  ;;  %v1576_v1 = vsel %vm685_vm4, %v1574_v24, %v1575_v48  ;;  %386 = vst.msk [vmem:[#allocation3 + $0x40] sm:$0xff] %vm303_vm2, %v370_v38  ;;  %v547_v8 = vld [vmem:[#allocation3 + $0x38] sm:$0xff] }
 0x19f   : > { %1601 = vrot.lane.b32.xlu1 %v1568_v55, %s1966_s22 }
 0x1a0   : > { %v1632_v56 = vadd.f32 %v1590_v36, %v1528_v11 }
 0x1a1   : > { %v739_v10 = vpop.permute.xlu1 %738 }
 0x1a3   : > { %1603 = vrot.lane.b32.xlu2 %v1571_v19, %s1966_s22  ;;  %1605 = vrot.lane.b32.xlu0 %v1573_v62, %s1966_s22  ;;  %v1400_v35 = vld [vmem:[#allocation3 + $0x28] sm:$0xff] }
 0x1a4   : > { %v1648_v59 = vadd.f32 %v1632_v56, %v1400_v35  ;;  %v983_v35 = vld [vmem:[#allocation3 + $0x78] sm:$0xff] }
 0x1a5   : > { %v1079_v9 = vpop.permute.xlu2 %1078  ;;  %v634_v30 = vpop.permute.xlu0 %633 }
 0x1a6   : > { %1664 = vst.msk [vmem:[#allocation3 + $0x28] sm:$0xff] %vm303_vm2, %v1648_v59  ;;  %v675_v15 = vadd.f32 %v634_v30, %v2427_v41 }
 0x1a7   : > { %1607 = vrot.lane.b32.xlu1 %v1576_v1, %s1966_s22 }
 0x1a8   : > { %v780_v20 = vadd.f32 %v739_v10, %v675_v15 }
 0x1a9   : > { %v1077_v29 = vpop.permute.xlu1 %1076 }
 0x1aa   : > { %v1110_v43 = vadd.f32 %v1077_v29, %v2434_v60  ;;  %v796_v49 = vadd.f32 %v780_v20, %v546_v5  ;;  %v1102_v60 = vadd.f32 %v2764_v17, %v2416_v26  ;;  %v1111_v26 = vadd.f32 %v1079_v9, %v2465_v42  ;;  %v1924_v42 = vld [vmem:[%s2955_s3] ss:$0 sm:$0xff] }
 0x1ab   : > { %1609 = vrot.lane.b32.xlu2 %v1578_v7, %s1966_s22 }
 0x1ac   : > { %v1214_v36 = vadd.f32 %v2789_v50, %v1110_v43  ;;  %812 = vst.msk [vmem:[#allocation3 + $0x30] sm:$0xff] %vm303_vm2, %v796_v49  ;;  %v548_v43 = vld [vmem:[#allocation3 + $0x40] sm:$0xff] }
 0x1ad   : > { %v1490_v51 = vpop.permute.xlu2 %1489  ;;  %v1680_v21 = vld [vmem:[#allocation3 + $0x28] sm:$0xff]  ;;  %v1165_v41 = vpop.permute.xlu0 %1164 }
 0x1ae   : > { %v1230_v47 = vadd.f32 %v1214_v36, %v982_v25  ;;  %1696 = vst.msk [vmem:[%s2536_s28 + $0x28] sm:$0xff] %vm303_vm2, %v1680_v21  ;;  %v1206_v50 = vadd.f32 %v1165_v41, %v1102_v60  ;;  %v352_v21 = vld [vmem:[%s2087_s16 + $0x50] sm:$0xff] }
 0x1af   : > { %v372_v38 = vadd.f32 %v1924_v42, %v352_v21 }
 0x1b0   : > { %1246 = vst.msk [vmem:[#allocation3 + $0x70] sm:$0xff] %vm303_vm2, %v1230_v47 }
 0x1b1   : > { %v1488_v54 = vpop.permute.xlu1 %1487  ;;  %388 = vst.msk [vmem:[#allocation3 + $0x50] sm:$0xff] %vm303_vm2, %v372_v38 }
 0x1b2   : > { %v1529_v27 = vadd.f32 %v1488_v54, %v2455_v28  ;;  %v351_v28 = vld [vmem:[%s2087_s16 + $0x48] sm:$0xff] }
 0x1b3   : > { %v974_v23 = vld [vmem:[#allocation3 + $0x30] sm:$0xff] }
 0x1b4   : > { %v1222_v45 = vadd.f32 %v1206_v50, %v974_v23  ;;  %v1633_v17 = vadd.f32 %v2808_v52, %v1529_v27  ;;  %v371_v52 = vadd.f32 %v1924_v42, %v351_v28 }
 0x1b5   : > { %v638_v13 = vpop.permute.xlu2 %637  ;;  %v1063_v4 = vpop.permute.xlu0 %1062 }
 0x1b6   : > { %1238 = vst.msk [vmem:[#allocation3 + $0x30] sm:$0xff] %vm303_vm2, %v1222_v45  ;;  %v677_v20 = vadd.f32 %v638_v13, %v2567_v22 }
 0x1b7   : > { %387 = vst.msk [vmem:[#allocation3 + $0x48] sm:$0xff] %vm303_vm2, %v371_v52 }
 0x1b9   : > { %v636_v55 = vpop.permute.xlu1 %635 }
 0x1ba   : > { %v676_v44 = vadd.f32 %v636_v55, %v2451_v33  ;;  %v353_v55 = vld [vmem:[%s2087_s16 + $0x58] sm:$0xff] }
 0x1bc   : > { %v781_v11 = vadd.f32 %v741_v40, %v676_v44  ;;  %v1103_v40 = vadd.f32 %v1063_v4, %v2440_v57  ;;  %v1530_v57 = vadd.f32 %v1490_v51, %v2493_v16 }
 0x1bd   : > { %v1169_v10 = vpop.permute.xlu2 %1168  ;;  %v1401_v24 = vld [vmem:[#allocation3 + $0x30] sm:$0xff]  ;;  %v1183_v19 = vpop.permute.xlu0 %1182 }
 0x1be   : > { %v797_v48 = vadd.f32 %v781_v11, %v547_v8  ;;  %v1649_v62 = vadd.f32 %v1633_v17, %v1401_v24  ;;  %v1215_v56 = vadd.f32 %v1183_v19, %v1111_v26  ;;  %v373_v8 = vadd.f32 %v1924_v42, %v353_v55  ;;  %v549_v26 = vld [vmem:[#allocation3 + $0x48] sm:$0xff] }
 0x1c0   : > { %813 = vst.msk [vmem:[#allocation3 + $0x38] sm:$0xff] %vm303_vm2, %v797_v48  ;;  %v1231_v33 = vadd.f32 %v1215_v56, %v983_v35 }
 0x1c1   : > { %1665 = vst.msk [vmem:[#allocation3 + $0x30] sm:$0xff] %vm303_vm2, %v1649_v62  ;;  %v1167_v59 = vpop.permute.xlu1 %1166 }
 0x1c2   : > { %1247 = vst.msk [vmem:[#allocation3 + $0x78] sm:$0xff] %vm303_vm2, %v1231_v33  ;;  %v1207_v34 = vadd.f32 %v1167_v59, %v1103_v40 }
 0x1c3   : > { %389 = vst.msk [vmem:[#allocation3 + $0x58] sm:$0xff] %vm303_vm2, %v373_v8 }
 0x1c5   : > { %v1067_v9 = vpop.permute.xlu2 %1066  ;;  %v1594_v1 = vpop.permute.xlu0 %1593 }
 0x1c6   : > { %v1634_v25 = vadd.f32 %v1594_v1, %v1530_v57 }
 0x1c7   : > { %v975_v30 = vld [vmem:[#allocation3 + $0x38] sm:$0xff] }
 0x1c8   : > { %v1681_v15 = vld [vmem:[#allocation3 + $0x30] sm:$0xff]  ;;  %v1223_v5 = vadd.f32 %v1207_v34, %v975_v30 }
 0x1c9   : > { %1697 = vst.msk [vmem:[%s2536_s28 + $0x30] sm:$0xff] %vm303_vm2, %v1681_v15  ;;  %v1065_v29 = vpop.permute.xlu1 %1064  ;;  %v550_v30 = vld [vmem:[#allocation3 + $0x50] sm:$0xff] }
 0x1ca   : > { %1239 = vst.msk [vmem:[#allocation3 + $0x38] sm:$0xff] %vm303_vm2, %v1223_v5  ;;  %v1104_v22 = vadd.f32 %v1065_v29, %v2561_v3 }
 0x1cc   : > { %v1208_v51 = vadd.f32 %v1169_v10, %v1104_v22 }
 0x1cd   : > { %v2879_v7 = vpop.permute.xlu2 %1501  ;;  %v743_v49 = vpop.permute.xlu0 %742 }
 0x1ce   : > { %v782_v36 = vadd.f32 %v743_v49, %v677_v20 }
 0x1d0   : > { %v798_v12 = vadd.f32 %v782_v36, %v548_v43 }
 0x1d1   : > { %v1402_v47 = vld [vmem:[#allocation3 + $0x38] sm:$0xff]  ;;  %v1500_v41 = vpop.permute.xlu1 %1499 }
 0x1d2   : > { %v1650_v60 = vadd.f32 %v1634_v25, %v1402_v47  ;;  %814 = vst.msk [vmem:[#allocation3 + $0x40] sm:$0xff] %vm303_vm2, %v798_v12  ;;  %v1535_v49 = vadd.f32 %v1500_v41, %v2586_v53  ;;  %v551_v47 = vld [vmem:[#allocation3 + $0x58] sm:$0xff] }
 0x1d4   : > { %1666 = vst.msk [vmem:[#allocation3 + $0x38] sm:$0xff] %vm303_vm2, %v1650_v60  ;;  %v1407_v60 = vld [vmem:[#allocation3 + $0x60] sm:$0xff] }
 0x1d5   : > { %v1598_v54 = vpop.permute.xlu2 %1597  ;;  %v1492_v16 = vpop.permute.xlu0 %1491 }
 0x1d6   : > { %v1531_v44 = vadd.f32 %v1492_v16, %v2604_v58 }
 0x1d9   : > { %v1596_v50 = vpop.permute.xlu1 %1595  ;;  %v976_v23 = vld [vmem:[#allocation3 + $0x40] sm:$0xff] }
 0x1da   : > { %v1224_v13 = vadd.f32 %v1208_v51, %v976_v23  ;;  %v1635_v10 = vadd.f32 %v1596_v50, %v1531_v44 }
 0x1db   : > { %v1682_v45 = vld [vmem:[#allocation3 + $0x38] sm:$0xff] }
 0x1dc   : > { %1698 = vst.msk [vmem:[%s2536_s28 + $0x38] sm:$0xff] %vm303_vm2, %v1682_v45 }
 0x1dd   : > { %1240 = vst.msk [vmem:[#allocation3 + $0x40] sm:$0xff] %vm303_vm2, %v1224_v13  ;;  %v747_v4 = vpop.permute.xlu2 %746  ;;  %v640_v27 = vpop.permute.xlu0 %639 }
 0x1de   : > { %v678_v3 = vadd.f32 %v640_v27, %v2602_v39  ;;  %v1105_v39 = vadd.f32 %v1067_v9, %v2591_v32 }
 0x1e1   : > { %v745_v11 = vpop.permute.xlu1 %744 }
 0x1e2   : > { %v783_v17 = vadd.f32 %v745_v11, %v678_v3 }
 0x1e4   : > { %v1403_v24 = vld [vmem:[#allocation3 + $0x40] sm:$0xff]  ;;  %v799_v48 = vadd.f32 %v783_v17, %v549_v26  ;;  %v1410_v26 = vld [vmem:[#allocation3 + $0x78] sm:$0xff] }
 0x1e5   : > { %v1651_v19 = vadd.f32 %v1635_v10, %v1403_v24  ;;  %v1496_v62 = vpop.permute.xlu2 %1495  ;;  %v1171_v56 = vpop.permute.xlu0 %1170 }
 0x1e6   : > { %815 = vst.msk [vmem:[#allocation3 + $0x48] sm:$0xff] %vm303_vm2, %v799_v48  ;;  %v1209_v35 = vadd.f32 %v1171_v56, %v1105_v39  ;;  %v1533_v53 = vadd.f32 %v1496_v62, %v2723_v6  ;;  %v1536_v48 = vadd.f32 %v2879_v7, %v2626_v2 }
 0x1e7   : > { %1667 = vst.msk [vmem:[#allocation3 + $0x40] sm:$0xff] %vm303_vm2, %v1651_v19 }
 0x1e9   : > { %v1494_v58 = vpop.permute.xlu1 %1493 }
 0x1ea   : > { %v1532_v34 = vadd.f32 %v1494_v58, %v2641_v46 }
 0x1ec   : > { %v1636_v29 = vadd.f32 %v1598_v54, %v1532_v34 }
 0x1ed   : > { %v977_v28 = vld [vmem:[#allocation3 + $0x48] sm:$0xff]  ;;  %v644_v33 = vpop.permute.xlu2 %643  ;;  %v1069_v52 = vpop.permute.xlu0 %1068 }
 0x1ee   : > { %v1683_v59 = vld [vmem:[#allocation3 + $0x40] sm:$0xff]  ;;  %v1225_v42 = vadd.f32 %v1209_v35, %v977_v28  ;;  %v1106_v46 = vadd.f32 %v1069_v52, %v2671_v14 }
 0x1ef   : > { %1699 = vst.msk [vmem:[%s2536_s28 + $0x40] sm:$0xff] %vm303_vm2, %v1683_v59  ;;  %v1409_v59 = vld [vmem:[#allocation3 + $0x70] sm:$0xff] }
 0x1f0   : > { %1241 = vst.msk [vmem:[#allocation3 + $0x48] sm:$0xff] %vm303_vm2, %v1225_v42 }
 0x1f1   : > { %v642_v40 = vpop.permute.xlu1 %641 }
 0x1f2   : > { %v679_v1 = vadd.f32 %v642_v40, %v2681_v63  ;;  %v680_v63 = vadd.f32 %v644_v33, %v2719_v31 }
 0x1f4   : > { %v784_v15 = vadd.f32 %v747_v4, %v679_v1 }
 0x1f5   : > { %v1175_v5 = vpop.permute.xlu2 %1174  ;;  %v1504_v9 = vpop.permute.xlu0 %1503 }
 0x1f6   : > { %v800_v32 = vadd.f32 %v784_v15, %v550_v30  ;;  %v1537_v28 = vadd.f32 %v1504_v9, %v2696_v61 }
 0x1f7   : > { %v1404_v20 = vld [vmem:[#allocation3 + $0x48] sm:$0xff] }
 0x1f8   : > { %v1652_v57 = vadd.f32 %v1636_v29, %v1404_v20  ;;  %816 = vst.msk [vmem:[#allocation3 + $0x50] sm:$0xff] %vm303_vm2, %v800_v32 }
 0x1f9   : > { %v1173_v43 = vpop.permute.xlu1 %1172 }
 0x1fa   : > { %1668 = vst.msk [vmem:[#allocation3 + $0x48] sm:$0xff] %vm303_vm2, %v1652_v57  ;;  %v1210_v25 = vadd.f32 %v1173_v43, %v1106_v46 }
 0x1fd   : > { %v1604_v36 = vpop.permute.xlu2 %1603  ;;  %v749_v12 = vpop.permute.xlu0 %748 }
 0x1fe   : > { %v1639_v21 = vadd.f32 %v1604_v36, %v1535_v49  ;;  %v785_v22 = vadd.f32 %v749_v12, %v680_v63 }
 0x1ff   : > { %v978_v38 = vld [vmem:[#allocation3 + $0x50] sm:$0xff] }
 0x200   : > { %v1226_v54 = vadd.f32 %v1210_v25, %v978_v38  ;;  %v1655_v16 = vadd.f32 %v1639_v21, %v1407_v60  ;;  %v801_v23 = vadd.f32 %v785_v22, %v551_v47 }
 0x201   : > { %v1684_v51 = vld [vmem:[#allocation3 + $0x48] sm:$0xff]  ;;  %v1071_v50 = vpop.permute.xlu1 %1070 }
 0x202   : > { %1700 = vst.msk [vmem:[%s2536_s28 + $0x48] sm:$0xff] %vm303_vm2, %v1684_v51  ;;  %v1107_v31 = vadd.f32 %v1071_v50, %v2707_v37 }
 0x203   : > { %1242 = vst.msk [vmem:[#allocation3 + $0x50] sm:$0xff] %vm303_vm2, %v1226_v54 }
 0x204   : > { %1671 = vst.msk [vmem:[#allocation3 + $0x60] sm:$0xff] %vm303_vm2, %v1655_v16  ;;  %v1211_v55 = vadd.f32 %v1175_v5, %v1107_v31 }
 0x205   : > { %817 = vst.msk [vmem:[#allocation3 + $0x58] sm:$0xff] %vm303_vm2, %v801_v23  ;;  %v1600_v14 = vpop.permute.xlu0 %1599  ;;  %v1610_v44 = vpop.permute.xlu2 %1609 }
 0x206   : > { %v1637_v41 = vadd.f32 %v1600_v14, %v1533_v53 }
 0x209   : > { %v1506_v45 = vpop.permute.xlu1 %1505 }
 0x20a   : > { %v1538_v13 = vadd.f32 %v1506_v45, %v2734_v0  ;;  %v1405_v4 = vld [vmem:[#allocation3 + $0x50] sm:$0xff] }
 0x20b   : > { %v1687_v27 = vld [vmem:[#allocation3 + $0x60] sm:$0xff]  ;;  %v1653_v3 = vadd.f32 %v1637_v41, %v1405_v4 }
 0x20c   : > { %1703 = vst.msk [vmem:[%s2536_s28 + $0x60] sm:$0xff] %vm303_vm2, %v1687_v27  ;;  %v979_v8 = vld [vmem:[#allocation3 + $0x58] sm:$0xff]  ;;  %v1642_v11 = vadd.f32 %v1610_v44, %v1538_v13 }
 0x20d   : > { %v1227_v6 = vadd.f32 %v1211_v55, %v979_v8  ;;  %1669 = vst.msk [vmem:[#allocation3 + $0x50] sm:$0xff] %vm303_vm2, %v1653_v3  ;;  %v1498_v37 = vpop.permute.xlu0 %1497 }
 0x20e   : > { %v1658_v17 = vadd.f32 %v1642_v11, %v1410_v26  ;;  %v1534_v10 = vadd.f32 %v1498_v37, %v2759_v18  ;;  %v1408_v18 = vld [vmem:[#allocation3 + $0x68] sm:$0xff] }
 0x20f   : > { %1243 = vst.msk [vmem:[#allocation3 + $0x58] sm:$0xff] %vm303_vm2, %v1227_v6 }
 0x210   : > { %1674 = vst.msk [vmem:[#allocation3 + $0x78] sm:$0xff] %vm303_vm2, %v1658_v17 }
 0x211   : > { %v1602_v0 = vpop.permute.xlu1 %1601 }
 0x212   : > { %v1638_v19 = vadd.f32 %v1602_v0, %v1534_v10 }
 0x214   : > { %v1685_v24 = vld [vmem:[#allocation3 + $0x50] sm:$0xff] }
 0x215   : > { %1701 = vst.msk [vmem:[%s2536_s28 + $0x50] sm:$0xff] %vm303_vm2, %v1685_v24  ;;  %v1606_v56 = vpop.permute.xlu0 %1605 }
 0x216   : > { %v1406_v62 = vld [vmem:[#allocation3 + $0x58] sm:$0xff]  ;;  %v1640_v35 = vadd.f32 %v1606_v56, %v1536_v48 }
 0x217   : > { %v1690_v58 = vld [vmem:[#allocation3 + $0x78] sm:$0xff]  ;;  %v1654_v39 = vadd.f32 %v1638_v19, %v1406_v62 }
 0x218   : > { %1706 = vst.msk [vmem:[%s2536_s28 + $0x78] sm:$0xff] %vm303_vm2, %v1690_v58  ;;  %v1656_v2 = vadd.f32 %v1640_v35, %v1408_v18 }
 0x219   : > { %1670 = vst.msk [vmem:[#allocation3 + $0x58] sm:$0xff] %vm303_vm2, %v1654_v39  ;;  %v1608_v33 = vpop.permute.xlu1 %1607 }
 0x21a   : > { %v1641_v7 = vadd.f32 %v1608_v33, %v1537_v28  ;;  %1672 = vst.msk [vmem:[#allocation3 + $0x68] sm:$0xff] %vm303_vm2, %v1656_v2 }
 0x21c   : > { %v1657_v42 = vadd.f32 %v1641_v7, %v1409_v59 }
 0x21e   : > { %1673 = vst.msk [vmem:[#allocation3 + $0x70] sm:$0xff] %vm303_vm2, %v1657_v42 }
 0x220   : > { %v1686_v52 = vld [vmem:[#allocation3 + $0x58] sm:$0xff] }
 0x221   : > { %1702 = vst.msk [vmem:[%s2536_s28 + $0x58] sm:$0xff] %vm303_vm2, %v1686_v52  ;;  %v1688_v40 = vld [vmem:[#allocation3 + $0x68] sm:$0xff] }
 0x222   : > { %1704 = vst.msk [vmem:[%s2536_s28 + $0x68] sm:$0xff] %vm303_vm2, %v1688_v40 }
 0x225   : > { %v1689_v61 = vld [vmem:[#allocation3 + $0x70] sm:$0xff] }
 0x226   : > { %1705 = vst.msk [vmem:[%s2536_s28 + $0x70] sm:$0xff] %vm303_vm2, %v1689_v61 }
 0x227 PF: > { %s14_s19 = sadd.s32 1, %s1963_s19   ;;  %s2958_s15 = smov %s1955_s17 }
 0x228   : > { %p11_p8 = scmp.ge.s32.totalorder %s14_s19, 6   ;;  %s2959_s16 = smov %s1959_s18 }
 0x229   : > { %s2960_s17 = smov %s2963_s20  ;;  %s2961_s18 = smov %s2967_s21 }
 0x22a   :  { %13 = sbr.rel (!%p11_p8) target bundleno = 3 (0x3), region = 74 }

</bundles_post_ra>
